<compile_context>
chip_gen: v6e
topology: v6e:2x2x1
jax: 0.10.0
libtpu: 0.0.40
codegen_flags: <defaults>
</compile_context>

<pallas_src>
import functools

import jax
import jax.numpy as jnp
from jax.experimental import pallas as pl
from jax.experimental.pallas import tpu as pltpu


def _sigmoid(z):
    # Same closed form used in kernel and reference (guaranteed Mosaic lowering).
    return 1.0 / (1.0 + jnp.exp(-z))


def blstm_kernel(x_ref, wih_ref, bih_ref, whhf_ref, whhb_ref, wdt_ref, bd_ref,
                 out_ref, gxf_ref, gxb_ref, embf_ref, embb_ref):
    # x_ref:    (BB, T, Din)
    # wih_ref:  (Din, 8K)   fwd gates in lanes [0:4K], bwd gates in [4K:8K]
    # bih_ref:  (1, 8K)     b_ih + b_hh per direction (f32)
    # whh*_ref: (K, 4K)     recurrent weights (pre-transposed)
    # wdt_ref:  (2K, Cp)    decode weight, pre-transposed + zero-padded lanes
    # bd_ref:   (1, Cp)     decode bias, zero-padded (f32)
    # out_ref:  (BB, T, Cp)
    # gx*_ref:  (BB, T, 4K) f32 scratch: precomputed input projections
    # emb*_ref: (BB, T, K)  f32 scratch: per-step hidden states
    BB, T, Din = x_ref.shape
    K4 = whhf_ref.shape[1]
    K = K4 // 4
    Cp = out_ref.shape[2]
    mm_dtype = wih_ref.dtype                      # f32, or bf16 (f32 accumulate)

    # ---- fused input projection for BOTH directions: one MXU matmul --------
    x2 = x_ref[...].reshape(BB * T, Din).astype(mm_dtype)
    gx = jnp.dot(x2, wih_ref[...], preferred_element_type=jnp.float32)
    gx = gx + bih_ref[...]                        # (BB*T, 8K) f32
    gxf_ref[...] = gx[:, :K4].reshape(BB, T, K4)
    gxb_ref[...] = gx[:, K4:].reshape(BB, T, K4)

    whh_f = whhf_ref[...]
    whh_b = whhb_ref[...]

    def cell(gates, c):
        # PyTorch gate order along the 4K axis: i | f | g | o
        i = _sigmoid(gates[:, 0 * K:1 * K])
        f = _sigmoid(gates[:, 1 * K:2 * K])
        g = jnp.tanh(gates[:, 2 * K:3 * K])
        o = _sigmoid(gates[:, 3 * K:4 * K])
        c_new = f * c + i * g
        h_new = o * jnp.tanh(c_new)
        return h_new, c_new

    def step(t, carry):
        h_f, c_f, h_b, c_b = carry
        tb = T - 1 - t                            # backward-direction time index

        g_f = (gxf_ref[:, pl.ds(t, 1), :].reshape(BB, K4)
               + jnp.dot(h_f.astype(mm_dtype), whh_f,
                         preferred_element_type=jnp.float32))
        g_b = (gxb_ref[:, pl.ds(tb, 1), :].reshape(BB, K4)
               + jnp.dot(h_b.astype(mm_dtype), whh_b,
                         preferred_element_type=jnp.float32))

        h_f, c_f = cell(g_f, c_f)
        h_b, c_b = cell(g_b, c_b)

        embf_ref[:, pl.ds(t, 1), :] = h_f.reshape(BB, 1, K)
        embb_ref[:, pl.ds(tb, 1), :] = h_b.reshape(BB, 1, K)
        return h_f, c_f, h_b, c_b

    z = jnp.zeros((BB, K), jnp.float32)
    jax.lax.fori_loop(0, T, step, (z, z, z, z), unroll=True)

    # ---- fused decode: one (BB*T, 2K) @ (2K, Cp) matmul, lane-dense output --
    e = jnp.concatenate([embf_ref[...].reshape(BB * T, K),
                         embb_ref[...].reshape(BB * T, K)], axis=1)
    logits = jnp.dot(e.astype(mm_dtype), wdt_ref[...],
                     preferred_element_type=jnp.float32) + bd_ref[...]
    out_ref[...] = logits.reshape(BB, T, Cp).astype(out_ref.dtype)


def prepare_params(params, matmul_dtype=jnp.float32, lane_pad=128):
    """One-time conversion of PyTorch-layout params into lane-dense kernel
    layout. All transposes / padding happen here (cached), never per call."""
    (w_ih_f, w_hh_f, b_ih_f, b_hh_f,
     w_ih_b, w_hh_b, b_ih_b, b_hh_b, w_dec, b_dec) = params
    K4 = w_ih_f.shape[0]
    K = K4 // 4
    C = w_dec.shape[0]
    Cp = ((C + lane_pad - 1) // lane_pad) * lane_pad   # pad classes to 128 lanes

    wih = jnp.concatenate([w_ih_f.T, w_ih_b.T], axis=1).astype(matmul_dtype)   # (Din, 8K)
    bih = jnp.concatenate([b_ih_f + b_hh_f,
                           b_ih_b + b_hh_b])[None, :].astype(jnp.float32)      # (1, 8K)
    whh_f = w_hh_f.T.astype(matmul_dtype)                                      # (K, 4K)
    whh_b = w_hh_b.T.astype(matmul_dtype)
    wdt = jnp.zeros((2 * K, Cp), matmul_dtype).at[:, :C].set(
        w_dec.T.astype(matmul_dtype))                                          # (2K, Cp)
    bd = jnp.zeros((1, Cp), jnp.float32).at[:, :C].set(b_dec.astype(jnp.float32))
    return wih, bih, whh_f, whh_b, wdt, bd


@functools.partial(jax.jit, static_argnames=("n_class", "block_b"))
def blstm_forward(x, kparams, n_class, block_b=None):
    wih, bih, whh_f, whh_b, wdt, bd = kparams
    B, T, Din = x.shape
    K4 = whh_f.shape[1]
    K = K4 // 4
    Cp = wdt.shape[1]

    if block_b is None:
        block_b = max(1, B // 2)      # >= 2 grid steps -> both v7x TCs get work
    assert B % block_b == 0
    grid = (B // block_b,)

    out = pl.pallas_call(
        blstm_kernel,
        out_shape=jax.ShapeDtypeStruct((B, T, Cp), jnp.float32),
        grid=grid,
        in_specs=[
            pl.BlockSpec((block_b, T, Din), lambda i: (i, 0, 0)),
            pl.BlockSpec(wih.shape, lambda i: (0, 0)),
            pl.BlockSpec(bih.shape, lambda i: (0, 0)),
            pl.BlockSpec(whh_f.shape, lambda i: (0, 0)),
            pl.BlockSpec(whh_b.shape, lambda i: (0, 0)),
            pl.BlockSpec(wdt.shape, lambda i: (0, 0)),
            pl.BlockSpec(bd.shape, lambda i: (0, 0)),
        ],
        out_specs=pl.BlockSpec((block_b, T, Cp), lambda i: (i, 0, 0)),
        scratch_shapes=[
            pltpu.VMEM((block_b, T, K4), jnp.float32),   # gx forward
            pltpu.VMEM((block_b, T, K4), jnp.float32),   # gx backward
            pltpu.VMEM((block_b, T, K), jnp.float32),    # h forward per step
            pltpu.VMEM((block_b, T, K), jnp.float32),    # h backward per step
        ],
        compiler_params=pltpu.CompilerParams(
            dimension_semantics=("parallel",)),
    )(x, wih, bih, whh_f, whh_b, wdt, bd)

    return out[:, :, :n_class]        # strip lane padding outside the kernel


# ---------------------------- pure-JAX reference -----------------------------

def _lstm_direction(x, w_ih, w_hh, b_ih, b_hh, reverse):
    B, T, _ = x.shape
    K = w_hh.shape[1]
    hp = jax.lax.Precision.HIGHEST
    h = jnp.zeros((B, K), jnp.float32)
    c = jnp.zeros((B, K), jnp.float32)
    hs = [None] * T
    order = range(T - 1, -1, -1) if reverse else range(T)
    for t in order:
        g = (jnp.dot(x[:, t, :], w_ih.T, precision=hp) + b_ih
             + jnp.dot(h, w_hh.T, precision=hp) + b_hh)
        i = _sigmoid(g[:, :K])
        f = _sigmoid(g[:, K:2 * K])
        gg = jnp.tanh(g[:, 2 * K:3 * K])
        o = _sigmoid(g[:, 3 * K:])
        c = f * c + i * gg
        h = o * jnp.tanh(c)
        hs[t] = h
    return jnp.stack(hs, axis=1)      # (B, T, K)


def reference_forward(x, params):
    (w_ih_f, w_hh_f, b_ih_f, b_hh_f,
     w_ih_b, w_hh_b, b_ih_b, b_hh_b, w_dec, b_dec) = params
    hf = _lstm_direction(x, w_ih_f, w_hh_f, b_ih_f, b_hh_f, reverse=False)
    hb = _lstm_direction(x, w_ih_b, w_hh_b, b_ih_b, b_hh_b, reverse=True)
    embed = jnp.concatenate([hf, hb], axis=-1)
    return jnp.dot(embed, w_dec.T, precision=jax.lax.Precision.HIGHEST) + b_dec


def init_params(key, input_size, embedding_dim, n_class):
    """PyTorch-layout params with nn.LSTM / nn.Linear default U(-1/sqrt(fan)) init."""
    K = embedding_dim
    ks = jax.random.split(key, 10)

    def u(k, shape, bound):
        return jax.random.uniform(k, shape, jnp.float32, -bound, bound)

    bl = K ** -0.5                           # LSTM: U(-1/sqrt(hidden), 1/sqrt(hidden))
    w_ih_f = u(ks[0], (4 * K, input_size), bl)
    w_hh_f = u(ks[1], (4 * K, K), bl)
    b_ih_f = u(ks[2], (4 * K,), bl)
    b_hh_f = u(ks[3], (4 * K,), bl)
    w_ih_b = u(ks[4], (4 * K, input_size), bl)
    w_hh_b = u(ks[5], (4 * K, K), bl)
    b_ih_b = u(ks[6], (4 * K,), bl)
    b_hh_b = u(ks[7], (4 * K,), bl)
    bd = (2 * K) ** -0.5                     # decode Linear fan_in = 2K
    w_dec = u(ks[8], (n_class, 2 * K), bd)
    b_dec = u(ks[9], (n_class,), bd)
    return (w_ih_f, w_hh_f, b_ih_f, b_hh_f,
            w_ih_b, w_hh_b, b_ih_b, b_hh_b, w_dec, b_dec)


if __name__ == "__main__":
    # Small shapes consistent with the module defaults: input_size=80, n_class=65.
    B, T, Din, K, C = 2, 8, 80, 32, 65   # batch, seq, input_size, embedding_dim, n_class

    key = jax.random.PRNGKey(0)
    k_x, k_p = jax.random.split(key)
    x = jax.random.normal(k_x, (B, T, Din), jnp.float32)
    params = init_params(k_p, Din, K, C)

    ref = reference_forward(x, params)

    # f32 MXU operands (accurate path; valid on v5e/v6e/v7x).
    kparams_f32 = prepare_params(params, matmul_dtype=jnp.float32)
    out_f32 = jax.block_until_ready(blstm_forward(x, kparams_f32, n_class=C))
    assert out_f32.shape == (B, T, C)
    assert jnp.allclose(out_f32, ref, atol=1e-3, rtol=1e-3), "f32 kernel mismatch"

    # bf16 MXU operands + f32 accumulation (v6e/v7x fast path); gates stay f32.
    kparams_bf16 = prepare_params(params, matmul_dtype=jnp.bfloat16)
    out_bf16 = jax.block_until_ready(blstm_forward(x, kparams_bf16, n_class=C))
    assert out_bf16.shape == (B, T, C)
    assert jnp.allclose(out_bf16, ref, atol=5e-2, rtol=5e-2), "bf16 kernel mismatch"

    print("KERNEL_OK")
</pallas_src>

<mosaic_0001>
module attributes {stable_mosaic.version = 11 : i64} {
  func.func @blstm_kernel(%arg0: i32, %arg1: memref<1x8x80xf32, #tpu.memory_space<vmem>>, %arg2: memref<80x256xf32, #tpu.memory_space<vmem>>, %arg3: memref<1x256xf32, #tpu.memory_space<vmem>>, %arg4: memref<32x128xf32, #tpu.memory_space<vmem>>, %arg5: memref<32x128xf32, #tpu.memory_space<vmem>>, %arg6: memref<64x128xf32, #tpu.memory_space<vmem>>, %arg7: memref<1x128xf32, #tpu.memory_space<vmem>>, %arg8: memref<1x8x128xf32, #tpu.memory_space<vmem>>, %arg9: memref<1x8x128xf32, #tpu.memory_space<vmem>>, %arg10: memref<1x8x128xf32, #tpu.memory_space<vmem>>, %arg11: memref<1x8x32xf32, #tpu.memory_space<vmem>>, %arg12: memref<1x8x32xf32, #tpu.memory_space<vmem>>) attributes {dimension_semantics = [#tpu.dimension_semantics<parallel>], iteration_bounds = array<i64: 2>, scalar_prefetch = 0 : i64, scratch_operands = 4 : i64, tpu.core_type = #tpu.core_type<tc>, window_params = [{transform_indices = @transform_0, window_bounds = array<i64: 1, 8, 80>}, {pipeline_mode = #tpu.pipeline_mode<synchronous>, transform_indices = @transform_1, window_bounds = array<i64: 80, 256>}, {pipeline_mode = #tpu.pipeline_mode<synchronous>, transform_indices = @transform_2, window_bounds = array<i64: 1, 256>}, {pipeline_mode = #tpu.pipeline_mode<synchronous>, transform_indices = @transform_3, window_bounds = array<i64: 32, 128>}, {pipeline_mode = #tpu.pipeline_mode<synchronous>, transform_indices = @transform_4, window_bounds = array<i64: 32, 128>}, {pipeline_mode = #tpu.pipeline_mode<synchronous>, transform_indices = @transform_5, window_bounds = array<i64: 64, 128>}, {pipeline_mode = #tpu.pipeline_mode<synchronous>, transform_indices = @transform_6, window_bounds = array<i64: 1, 128>}, {transform_indices = @transform_7, window_bounds = array<i64: 1, 8, 128>}]} {
    %c0 = arith.constant 0 : index
    %c0_0 = arith.constant 0 : index
    %c0_1 = arith.constant 0 : index
    %0 = vector.load %arg1[%c0, %c0_0, %c0_1] : memref<1x8x80xf32, #tpu.memory_space<vmem>>, vector<1x8x80xf32>
    %1 = vector.shape_cast %0 : vector<1x8x80xf32> to vector<8x80xf32>
    %c0_2 = arith.constant 0 : index
    %c0_3 = arith.constant 0 : index
    %2 = vector.load %arg2[%c0_2, %c0_3] : memref<80x256xf32, #tpu.memory_space<vmem>>, vector<80x256xf32>
    %cst = arith.constant dense<0.000000e+00> : vector<8x256xf32>
    %3 = tpu.matmul %1, %2, %cst {dimension_numbers = #tpu.dot_dimension_numbers<[1], [0], [0], [1], [0, 0, 1, 1], [], []>} : vector<8x80xf32>, vector<80x256xf32>, vector<8x256xf32> -> vector<8x256xf32>
    %c0_4 = arith.constant 0 : index
    %c0_5 = arith.constant 0 : index
    %4 = vector.load %arg3[%c0_4, %c0_5] : memref<1x256xf32, #tpu.memory_space<vmem>>, vector<1x256xf32>
    %5 = vector.broadcast %4 : vector<1x256xf32> to vector<8x256xf32>
    %6 = arith.addf %3, %5 : vector<8x256xf32>
    %7 = vector.extract_strided_slice %6 {offsets = [0, 0], sizes = [8, 128], strides = [1, 1]} : vector<8x256xf32> to vector<8x128xf32>
    %8 = vector.shape_cast %7 : vector<8x128xf32> to vector<1x8x128xf32>
    %c0_6 = arith.constant 0 : index
    %c0_7 = arith.constant 0 : index
    %c0_8 = arith.constant 0 : index
    %9 = vector.load %arg9[%c0_6, %c0_7, %c0_8] : memref<1x8x128xf32, #tpu.memory_space<vmem>>, vector<1x8x128xf32>
    tpu.vector_store %arg9[%c0_6, %c0_7, %c0_8], %8 {strides = array<i32>} : memref<1x8x128xf32, #tpu.memory_space<vmem>>, vector<1x8x128xf32>,
    %10 = vector.extract_strided_slice %6 {offsets = [0, 128], sizes = [8, 128], strides = [1, 1]} : vector<8x256xf32> to vector<8x128xf32>
    %11 = vector.shape_cast %10 : vector<8x128xf32> to vector<1x8x128xf32>
    %c0_9 = arith.constant 0 : index
    %c0_10 = arith.constant 0 : index
    %c0_11 = arith.constant 0 : index
    %12 = vector.load %arg10[%c0_9, %c0_10, %c0_11] : memref<1x8x128xf32, #tpu.memory_space<vmem>>, vector<1x8x128xf32>
    tpu.vector_store %arg10[%c0_9, %c0_10, %c0_11], %11 {strides = array<i32>} : memref<1x8x128xf32, #tpu.memory_space<vmem>>, vector<1x8x128xf32>,
    %c0_12 = arith.constant 0 : index
    %c0_13 = arith.constant 0 : index
    %13 = vector.load %arg4[%c0_12, %c0_13] : memref<32x128xf32, #tpu.memory_space<vmem>>, vector<32x128xf32>
    %c0_14 = arith.constant 0 : index
    %c0_15 = arith.constant 0 : index
    %14 = vector.load %arg5[%c0_14, %c0_15] : memref<32x128xf32, #tpu.memory_space<vmem>>, vector<32x128xf32>
    %cst_16 = arith.constant 0.000000e+00 : f32
    %15 = vector.broadcast %cst_16 : f32 to vector<1x32xf32>
    %c0_i32 = arith.constant 0 : i32
    %c7_i32 = arith.constant 7 : i32
    %16 = arith.subi %c7_i32, %c0_i32 : i32
    %c0_17 = arith.constant 0 : index
    %17 = arith.index_cast %c0_i32 : i32 to index
    %c0_18 = arith.constant 0 : index
    %18 = vector.load %arg9[%c0_17, %17, %c0_18] : memref<1x8x128xf32, #tpu.memory_space<vmem>>, vector<1x1x128xf32>
    %19 = vector.shape_cast %18 : vector<1x1x128xf32> to vector<1x128xf32>
    %cst_19 = arith.constant dense<0.000000e+00> : vector<1x128xf32>
    %20 = tpu.matmul %15, %13, %cst_19 {dimension_numbers = #tpu.dot_dimension_numbers<[1], [0], [0], [1], [0, 0, 1, 1], [], []>} : vector<1x32xf32>, vector<32x128xf32>, vector<1x128xf32> -> vector<1x128xf32>
    %21 = arith.addf %19, %20 : vector<1x128xf32>
    %c0_20 = arith.constant 0 : index
    %22 = arith.index_cast %16 : i32 to index
    %c0_21 = arith.constant 0 : index
    %23 = vector.load %arg10[%c0_20, %22, %c0_21] : memref<1x8x128xf32, #tpu.memory_space<vmem>>, vector<1x1x128xf32>
    %24 = vector.shape_cast %23 : vector<1x1x128xf32> to vector<1x128xf32>
    %cst_22 = arith.constant dense<0.000000e+00> : vector<1x128xf32>
    %25 = tpu.matmul %15, %14, %cst_22 {dimension_numbers = #tpu.dot_dimension_numbers<[1], [0], [0], [1], [0, 0, 1, 1], [], []>} : vector<1x32xf32>, vector<32x128xf32>, vector<1x128xf32> -> vector<1x128xf32>
    %26 = arith.addf %24, %25 : vector<1x128xf32>
    %27 = vector.extract_strided_slice %21 {offsets = [0, 0], sizes = [1, 32], strides = [1, 1]} : vector<1x128xf32> to vector<1x32xf32>
    %cst_23 = arith.constant 0.000000e+00 : f32
    %28 = vector.broadcast %cst_23 : f32 to vector<1x32xf32>
    %29 = arith.subf %28, %27 : vector<1x32xf32>
    %30 = math.exp %29 : vector<1x32xf32>
    %cst_24 = arith.constant 1.000000e+00 : f32
    %31 = vector.broadcast %cst_24 : f32 to vector<1x32xf32>
    %32 = arith.addf %31, %30 : vector<1x32xf32>
    %cst_25 = arith.constant 1.000000e+00 : f32
    %33 = vector.broadcast %cst_25 : f32 to vector<1x32xf32>
    %34 = arith.divf %33, %32 : vector<1x32xf32>
    %35 = vector.extract_strided_slice %21 {offsets = [0, 32], sizes = [1, 32], strides = [1, 1]} : vector<1x128xf32> to vector<1x32xf32>
    %cst_26 = arith.constant 0.000000e+00 : f32
    %36 = vector.broadcast %cst_26 : f32 to vector<1x32xf32>
    %37 = arith.subf %36, %35 : vector<1x32xf32>
    %38 = math.exp %37 : vector<1x32xf32>
    %cst_27 = arith.constant 1.000000e+00 : f32
    %39 = vector.broadcast %cst_27 : f32 to vector<1x32xf32>
    %40 = arith.addf %39, %38 : vector<1x32xf32>
    %cst_28 = arith.constant 1.000000e+00 : f32
    %41 = vector.broadcast %cst_28 : f32 to vector<1x32xf32>
    %42 = arith.divf %41, %40 : vector<1x32xf32>
    %43 = vector.extract_strided_slice %21 {offsets = [0, 64], sizes = [1, 32], strides = [1, 1]} : vector<1x128xf32> to vector<1x32xf32>
    %44 = math.tanh %43 : vector<1x32xf32>
    %45 = vector.extract_strided_slice %21 {offsets = [0, 96], sizes = [1, 32], strides = [1, 1]} : vector<1x128xf32> to vector<1x32xf32>
    %cst_29 = arith.constant 0.000000e+00 : f32
    %46 = vector.broadcast %cst_29 : f32 to vector<1x32xf32>
    %47 = arith.subf %46, %45 : vector<1x32xf32>
    %48 = math.exp %47 : vector<1x32xf32>
    %cst_30 = arith.constant 1.000000e+00 : f32
    %49 = vector.broadcast %cst_30 : f32 to vector<1x32xf32>
    %50 = arith.addf %49, %48 : vector<1x32xf32>
    %cst_31 = arith.constant 1.000000e+00 : f32
    %51 = vector.broadcast %cst_31 : f32 to vector<1x32xf32>
    %52 = arith.divf %51, %50 : vector<1x32xf32>
    %53 = arith.mulf %42, %15 : vector<1x32xf32>
    %54 = arith.mulf %34, %44 : vector<1x32xf32>
    %55 = arith.addf %53, %54 : vector<1x32xf32>
    %56 = math.tanh %55 : vector<1x32xf32>
    %57 = arith.mulf %52, %56 : vector<1x32xf32>
    %58 = vector.extract_strided_slice %26 {offsets = [0, 0], sizes = [1, 32], strides = [1, 1]} : vector<1x128xf32> to vector<1x32xf32>
    %cst_32 = arith.constant 0.000000e+00 : f32
    %59 = vector.broadcast %cst_32 : f32 to vector<1x32xf32>
    %60 = arith.subf %59, %58 : vector<1x32xf32>
    %61 = math.exp %60 : vector<1x32xf32>
    %cst_33 = arith.constant 1.000000e+00 : f32
    %62 = vector.broadcast %cst_33 : f32 to vector<1x32xf32>
    %63 = arith.addf %62, %61 : vector<1x32xf32>
    %cst_34 = arith.constant 1.000000e+00 : f32
    %64 = vector.broadcast %cst_34 : f32 to vector<1x32xf32>
    %65 = arith.divf %64, %63 : vector<1x32xf32>
    %66 = vector.extract_strided_slice %26 {offsets = [0, 32], sizes = [1, 32], strides = [1, 1]} : vector<1x128xf32> to vector<1x32xf32>
    %cst_35 = arith.constant 0.000000e+00 : f32
    %67 = vector.broadcast %cst_35 : f32 to vector<1x32xf32>
    %68 = arith.subf %67, %66 : vector<1x32xf32>
    %69 = math.exp %68 : vector<1x32xf32>
    %cst_36 = arith.constant 1.000000e+00 : f32
    %70 = vector.broadcast %cst_36 : f32 to vector<1x32xf32>
    %71 = arith.addf %70, %69 : vector<1x32xf32>
    %cst_37 = arith.constant 1.000000e+00 : f32
    %72 = vector.broadcast %cst_37 : f32 to vector<1x32xf32>
    %73 = arith.divf %72, %71 : vector<1x32xf32>
    %74 = vector.extract_strided_slice %26 {offsets = [0, 64], sizes = [1, 32], strides = [1, 1]} : vector<1x128xf32> to vector<1x32xf32>
    %75 = math.tanh %74 : vector<1x32xf32>
    %76 = vector.extract_strided_slice %26 {offsets = [0, 96], sizes = [1, 32], strides = [1, 1]} : vector<1x128xf32> to vector<1x32xf32>
    %cst_38 = arith.constant 0.000000e+00 : f32
    %77 = vector.broadcast %cst_38 : f32 to vector<1x32xf32>
    %78 = arith.subf %77, %76 : vector<1x32xf32>
    %79 = math.exp %78 : vector<1x32xf32>
    %cst_39 = arith.constant 1.000000e+00 : f32
    %80 = vector.broadcast %cst_39 : f32 to vector<1x32xf32>
    %81 = arith.addf %80, %79 : vector<1x32xf32>
    %cst_40 = arith.constant 1.000000e+00 : f32
    %82 = vector.broadcast %cst_40 : f32 to vector<1x32xf32>
    %83 = arith.divf %82, %81 : vector<1x32xf32>
    %84 = arith.mulf %73, %15 : vector<1x32xf32>
    %85 = arith.mulf %65, %75 : vector<1x32xf32>
    %86 = arith.addf %84, %85 : vector<1x32xf32>
    %87 = math.tanh %86 : vector<1x32xf32>
    %88 = arith.mulf %83, %87 : vector<1x32xf32>
    %89 = vector.shape_cast %57 : vector<1x32xf32> to vector<1x1x32xf32>
    %c0_41 = arith.constant 0 : index
    %90 = arith.index_cast %c0_i32 : i32 to index
    %c0_42 = arith.constant 0 : index
    %91 = vector.load %arg11[%c0_41, %90, %c0_42] : memref<1x8x32xf32, #tpu.memory_space<vmem>>, vector<1x1x32xf32>
    tpu.vector_store %arg11[%c0_41, %90, %c0_42], %89 {strides = array<i32>} : memref<1x8x32xf32, #tpu.memory_space<vmem>>, vector<1x1x32xf32>,
    %92 = vector.shape_cast %88 : vector<1x32xf32> to vector<1x1x32xf32>
    %c0_43 = arith.constant 0 : index
    %93 = arith.index_cast %16 : i32 to index
    %c0_44 = arith.constant 0 : index
    %94 = vector.load %arg12[%c0_43, %93, %c0_44] : memref<1x8x32xf32, #tpu.memory_space<vmem>>, vector<1x1x32xf32>
    tpu.vector_store %arg12[%c0_43, %93, %c0_44], %92 {strides = array<i32>} : memref<1x8x32xf32, #tpu.memory_space<vmem>>, vector<1x1x32xf32>,
    %c1_i32 = arith.constant 1 : i32
    %c7_i32_45 = arith.constant 7 : i32
    %95 = arith.subi %c7_i32_45, %c1_i32 : i32
    %c0_46 = arith.constant 0 : index
    %96 = arith.index_cast %c1_i32 : i32 to index
    %c0_47 = arith.constant 0 : index
    %97 = vector.load %arg9[%c0_46, %96, %c0_47] : memref<1x8x128xf32, #tpu.memory_space<vmem>>, vector<1x1x128xf32>
    %98 = vector.shape_cast %97 : vector<1x1x128xf32> to vector<1x128xf32>
    %cst_48 = arith.constant dense<0.000000e+00> : vector<1x128xf32>
    %99 = tpu.matmul %57, %13, %cst_48 {dimension_numbers = #tpu.dot_dimension_numbers<[1], [0], [0], [1], [0, 0, 1, 1], [], []>} : vector<1x32xf32>, vector<32x128xf32>, vector<1x128xf32> -> vector<1x128xf32>
    %100 = arith.addf %98, %99 : vector<1x128xf32>
    %c0_49 = arith.constant 0 : index
    %101 = arith.index_cast %95 : i32 to index
    %c0_50 = arith.constant 0 : index
    %102 = vector.load %arg10[%c0_49, %101, %c0_50] : memref<1x8x128xf32, #tpu.memory_space<vmem>>, vector<1x1x128xf32>
    %103 = vector.shape_cast %102 : vector<1x1x128xf32> to vector<1x128xf32>
    %cst_51 = arith.constant dense<0.000000e+00> : vector<1x128xf32>
    %104 = tpu.matmul %88, %14, %cst_51 {dimension_numbers = #tpu.dot_dimension_numbers<[1], [0], [0], [1], [0, 0, 1, 1], [], []>} : vector<1x32xf32>, vector<32x128xf32>, vector<1x128xf32> -> vector<1x128xf32>
    %105 = arith.addf %103, %104 : vector<1x128xf32>
    %106 = vector.extract_strided_slice %100 {offsets = [0, 0], sizes = [1, 32], strides = [1, 1]} : vector<1x128xf32> to vector<1x32xf32>
    %cst_52 = arith.constant 0.000000e+00 : f32
    %107 = vector.broadcast %cst_52 : f32 to vector<1x32xf32>
    %108 = arith.subf %107, %106 : vector<1x32xf32>
    %109 = math.exp %108 : vector<1x32xf32>
    %cst_53 = arith.constant 1.000000e+00 : f32
    %110 = vector.broadcast %cst_53 : f32 to vector<1x32xf32>
    %111 = arith.addf %110, %109 : vector<1x32xf32>
    %cst_54 = arith.constant 1.000000e+00 : f32
    %112 = vector.broadcast %cst_54 : f32 to vector<1x32xf32>
    %113 = arith.divf %112, %111 : vector<1x32xf32>
    %114 = vector.extract_strided_slice %100 {offsets = [0, 32], sizes = [1, 32], strides = [1, 1]} : vector<1x128xf32> to vector<1x32xf32>
    %cst_55 = arith.constant 0.000000e+00 : f32
    %115 = vector.broadcast %cst_55 : f32 to vector<1x32xf32>
    %116 = arith.subf %115, %114 : vector<1x32xf32>
    %117 = math.exp %116 : vector<1x32xf32>
    %cst_56 = arith.constant 1.000000e+00 : f32
    %118 = vector.broadcast %cst_56 : f32 to vector<1x32xf32>
    %119 = arith.addf %118, %117 : vector<1x32xf32>
    %cst_57 = arith.constant 1.000000e+00 : f32
    %120 = vector.broadcast %cst_57 : f32 to vector<1x32xf32>
    %121 = arith.divf %120, %119 : vector<1x32xf32>
    %122 = vector.extract_strided_slice %100 {offsets = [0, 64], sizes = [1, 32], strides = [1, 1]} : vector<1x128xf32> to vector<1x32xf32>
    %123 = math.tanh %122 : vector<1x32xf32>
    %124 = vector.extract_strided_slice %100 {offsets = [0, 96], sizes = [1, 32], strides = [1, 1]} : vector<1x128xf32> to vector<1x32xf32>
    %cst_58 = arith.constant 0.000000e+00 : f32
    %125 = vector.broadcast %cst_58 : f32 to vector<1x32xf32>
    %126 = arith.subf %125, %124 : vector<1x32xf32>
    %127 = math.exp %126 : vector<1x32xf32>
    %cst_59 = arith.constant 1.000000e+00 : f32
    %128 = vector.broadcast %cst_59 : f32 to vector<1x32xf32>
    %129 = arith.addf %128, %127 : vector<1x32xf32>
    %cst_60 = arith.constant 1.000000e+00 : f32
    %130 = vector.broadcast %cst_60 : f32 to vector<1x32xf32>
    %131 = arith.divf %130, %129 : vector<1x32xf32>
    %132 = arith.mulf %121, %55 : vector<1x32xf32>
    %133 = arith.mulf %113, %123 : vector<1x32xf32>
    %134 = arith.addf %132, %133 : vector<1x32xf32>
    %135 = math.tanh %134 : vector<1x32xf32>
    %136 = arith.mulf %131, %135 : vector<1x32xf32>
    %137 = vector.extract_strided_slice %105 {offsets = [0, 0], sizes = [1, 32], strides = [1, 1]} : vector<1x128xf32> to vector<1x32xf32>
    %cst_61 = arith.constant 0.000000e+00 : f32
    %138 = vector.broadcast %cst_61 : f32 to vector<1x32xf32>
    %139 = arith.subf %138, %137 : vector<1x32xf32>
    %140 = math.exp %139 : vector<1x32xf32>
    %cst_62 = arith.constant 1.000000e+00 : f32
    %141 = vector.broadcast %cst_62 : f32 to vector<1x32xf32>
    %142 = arith.addf %141, %140 : vector<1x32xf32>
    %cst_63 = arith.constant 1.000000e+00 : f32
    %143 = vector.broadcast %cst_63 : f32 to vector<1x32xf32>
    %144 = arith.divf %143, %142 : vector<1x32xf32>
    %145 = vector.extract_strided_slice %105 {offsets = [0, 32], sizes = [1, 32], strides = [1, 1]} : vector<1x128xf32> to vector<1x32xf32>
    %cst_64 = arith.constant 0.000000e+00 : f32
    %146 = vector.broadcast %cst_64 : f32 to vector<1x32xf32>
    %147 = arith.subf %146, %145 : vector<1x32xf32>
    %148 = math.exp %147 : vector<1x32xf32>
    %cst_65 = arith.constant 1.000000e+00 : f32
    %149 = vector.broadcast %cst_65 : f32 to vector<1x32xf32>
    %150 = arith.addf %149, %148 : vector<1x32xf32>
    %cst_66 = arith.constant 1.000000e+00 : f32
    %151 = vector.broadcast %cst_66 : f32 to vector<1x32xf32>
    %152 = arith.divf %151, %150 : vector<1x32xf32>
    %153 = vector.extract_strided_slice %105 {offsets = [0, 64], sizes = [1, 32], strides = [1, 1]} : vector<1x128xf32> to vector<1x32xf32>
    %154 = math.tanh %153 : vector<1x32xf32>
    %155 = vector.extract_strided_slice %105 {offsets = [0, 96], sizes = [1, 32], strides = [1, 1]} : vector<1x128xf32> to vector<1x32xf32>
    %cst_67 = arith.constant 0.000000e+00 : f32
    %156 = vector.broadcast %cst_67 : f32 to vector<1x32xf32>
    %157 = arith.subf %156, %155 : vector<1x32xf32>
    %158 = math.exp %157 : vector<1x32xf32>
    %cst_68 = arith.constant 1.000000e+00 : f32
    %159 = vector.broadcast %cst_68 : f32 to vector<1x32xf32>
    %160 = arith.addf %159, %158 : vector<1x32xf32>
    %cst_69 = arith.constant 1.000000e+00 : f32
    %161 = vector.broadcast %cst_69 : f32 to vector<1x32xf32>
    %162 = arith.divf %161, %160 : vector<1x32xf32>
    %163 = arith.mulf %152, %86 : vector<1x32xf32>
    %164 = arith.mulf %144, %154 : vector<1x32xf32>
    %165 = arith.addf %163, %164 : vector<1x32xf32>
    %166 = math.tanh %165 : vector<1x32xf32>
    %167 = arith.mulf %162, %166 : vector<1x32xf32>
    %168 = vector.shape_cast %136 : vector<1x32xf32> to vector<1x1x32xf32>
    %c0_70 = arith.constant 0 : index
    %169 = arith.index_cast %c1_i32 : i32 to index
    %c0_71 = arith.constant 0 : index
    %170 = vector.load %arg11[%c0_70, %169, %c0_71] : memref<1x8x32xf32, #tpu.memory_space<vmem>>, vector<1x1x32xf32>
    tpu.vector_store %arg11[%c0_70, %169, %c0_71], %168 {strides = array<i32>} : memref<1x8x32xf32, #tpu.memory_space<vmem>>, vector<1x1x32xf32>,
    %171 = vector.shape_cast %167 : vector<1x32xf32> to vector<1x1x32xf32>
    %c0_72 = arith.constant 0 : index
    %172 = arith.index_cast %95 : i32 to index
    %c0_73 = arith.constant 0 : index
    %173 = vector.load %arg12[%c0_72, %172, %c0_73] : memref<1x8x32xf32, #tpu.memory_space<vmem>>, vector<1x1x32xf32>
    tpu.vector_store %arg12[%c0_72, %172, %c0_73], %171 {strides = array<i32>} : memref<1x8x32xf32, #tpu.memory_space<vmem>>, vector<1x1x32xf32>,
    %c2_i32 = arith.constant 2 : i32
    %c7_i32_74 = arith.constant 7 : i32
    %174 = arith.subi %c7_i32_74, %c2_i32 : i32
    %c0_75 = arith.constant 0 : index
    %175 = arith.index_cast %c2_i32 : i32 to index
    %c0_76 = arith.constant 0 : index
    %176 = vector.load %arg9[%c0_75, %175, %c0_76] : memref<1x8x128xf32, #tpu.memory_space<vmem>>, vector<1x1x128xf32>
    %177 = vector.shape_cast %176 : vector<1x1x128xf32> to vector<1x128xf32>
    %cst_77 = arith.constant dense<0.000000e+00> : vector<1x128xf32>
    %178 = tpu.matmul %136, %13, %cst_77 {dimension_numbers = #tpu.dot_dimension_numbers<[1], [0], [0], [1], [0, 0, 1, 1], [], []>} : vector<1x32xf32>, vector<32x128xf32>, vector<1x128xf32> -> vector<1x128xf32>
    %179 = arith.addf %177, %178 : vector<1x128xf32>
    %c0_78 = arith.constant 0 : index
    %180 = arith.index_cast %174 : i32 to index
    %c0_79 = arith.constant 0 : index
    %181 = vector.load %arg10[%c0_78, %180, %c0_79] : memref<1x8x128xf32, #tpu.memory_space<vmem>>, vector<1x1x128xf32>
    %182 = vector.shape_cast %181 : vector<1x1x128xf32> to vector<1x128xf32>
    %cst_80 = arith.constant dense<0.000000e+00> : vector<1x128xf32>
    %183 = tpu.matmul %167, %14, %cst_80 {dimension_numbers = #tpu.dot_dimension_numbers<[1], [0], [0], [1], [0, 0, 1, 1], [], []>} : vector<1x32xf32>, vector<32x128xf32>, vector<1x128xf32> -> vector<1x128xf32>
    %184 = arith.addf %182, %183 : vector<1x128xf32>
    %185 = vector.extract_strided_slice %179 {offsets = [0, 0], sizes = [1, 32], strides = [1, 1]} : vector<1x128xf32> to vector<1x32xf32>
    %cst_81 = arith.constant 0.000000e+00 : f32
    %186 = vector.broadcast %cst_81 : f32 to vector<1x32xf32>
    %187 = arith.subf %186, %185 : vector<1x32xf32>
    %188 = math.exp %187 : vector<1x32xf32>
    %cst_82 = arith.constant 1.000000e+00 : f32
    %189 = vector.broadcast %cst_82 : f32 to vector<1x32xf32>
    %190 = arith.addf %189, %188 : vector<1x32xf32>
    %cst_83 = arith.constant 1.000000e+00 : f32
    %191 = vector.broadcast %cst_83 : f32 to vector<1x32xf32>
    %192 = arith.divf %191, %190 : vector<1x32xf32>
    %193 = vector.extract_strided_slice %179 {offsets = [0, 32], sizes = [1, 32], strides = [1, 1]} : vector<1x128xf32> to vector<1x32xf32>
    %cst_84 = arith.constant 0.000000e+00 : f32
    %194 = vector.broadcast %cst_84 : f32 to vector<1x32xf32>
    %195 = arith.subf %194, %193 : vector<1x32xf32>
    %196 = math.exp %195 : vector<1x32xf32>
    %cst_85 = arith.constant 1.000000e+00 : f32
    %197 = vector.broadcast %cst_85 : f32 to vector<1x32xf32>
    %198 = arith.addf %197, %196 : vector<1x32xf32>
    %cst_86 = arith.constant 1.000000e+00 : f32
    %199 = vector.broadcast %cst_86 : f32 to vector<1x32xf32>
    %200 = arith.divf %199, %198 : vector<1x32xf32>
    %201 = vector.extract_strided_slice %179 {offsets = [0, 64], sizes = [1, 32], strides = [1, 1]} : vector<1x128xf32> to vector<1x32xf32>
    %202 = math.tanh %201 : vector<1x32xf32>
    %203 = vector.extract_strided_slice %179 {offsets = [0, 96], sizes = [1, 32], strides = [1, 1]} : vector<1x128xf32> to vector<1x32xf32>
    %cst_87 = arith.constant 0.000000e+00 : f32
    %204 = vector.broadcast %cst_87 : f32 to vector<1x32xf32>
    %205 = arith.subf %204, %203 : vector<1x32xf32>
    %206 = math.exp %205 : vector<1x32xf32>
    %cst_88 = arith.constant 1.000000e+00 : f32
    %207 = vector.broadcast %cst_88 : f32 to vector<1x32xf32>
    %208 = arith.addf %207, %206 : vector<1x32xf32>
    %cst_89 = arith.constant 1.000000e+00 : f32
    %209 = vector.broadcast %cst_89 : f32 to vector<1x32xf32>
    %210 = arith.divf %209, %208 : vector<1x32xf32>
    %211 = arith.mulf %200, %134 : vector<1x32xf32>
    %212 = arith.mulf %192, %202 : vector<1x32xf32>
    %213 = arith.addf %211, %212 : vector<1x32xf32>
    %214 = math.tanh %213 : vector<1x32xf32>
    %215 = arith.mulf %210, %214 : vector<1x32xf32>
    %216 = vector.extract_strided_slice %184 {offsets = [0, 0], sizes = [1, 32], strides = [1, 1]} : vector<1x128xf32> to vector<1x32xf32>
    %cst_90 = arith.constant 0.000000e+00 : f32
    %217 = vector.broadcast %cst_90 : f32 to vector<1x32xf32>
    %218 = arith.subf %217, %216 : vector<1x32xf32>
    %219 = math.exp %218 : vector<1x32xf32>
    %cst_91 = arith.constant 1.000000e+00 : f32
    %220 = vector.broadcast %cst_91 : f32 to vector<1x32xf32>
    %221 = arith.addf %220, %219 : vector<1x32xf32>
    %cst_92 = arith.constant 1.000000e+00 : f32
    %222 = vector.broadcast %cst_92 : f32 to vector<1x32xf32>
    %223 = arith.divf %222, %221 : vector<1x32xf32>
    %224 = vector.extract_strided_slice %184 {offsets = [0, 32], sizes = [1, 32], strides = [1, 1]} : vector<1x128xf32> to vector<1x32xf32>
    %cst_93 = arith.constant 0.000000e+00 : f32
    %225 = vector.broadcast %cst_93 : f32 to vector<1x32xf32>
    %226 = arith.subf %225, %224 : vector<1x32xf32>
    %227 = math.exp %226 : vector<1x32xf32>
    %cst_94 = arith.constant 1.000000e+00 : f32
    %228 = vector.broadcast %cst_94 : f32 to vector<1x32xf32>
    %229 = arith.addf %228, %227 : vector<1x32xf32>
    %cst_95 = arith.constant 1.000000e+00 : f32
    %230 = vector.broadcast %cst_95 : f32 to vector<1x32xf32>
    %231 = arith.divf %230, %229 : vector<1x32xf32>
    %232 = vector.extract_strided_slice %184 {offsets = [0, 64], sizes = [1, 32], strides = [1, 1]} : vector<1x128xf32> to vector<1x32xf32>
    %233 = math.tanh %232 : vector<1x32xf32>
    %234 = vector.extract_strided_slice %184 {offsets = [0, 96], sizes = [1, 32], strides = [1, 1]} : vector<1x128xf32> to vector<1x32xf32>
    %cst_96 = arith.constant 0.000000e+00 : f32
    %235 = vector.broadcast %cst_96 : f32 to vector<1x32xf32>
    %236 = arith.subf %235, %234 : vector<1x32xf32>
    %237 = math.exp %236 : vector<1x32xf32>
    %cst_97 = arith.constant 1.000000e+00 : f32
    %238 = vector.broadcast %cst_97 : f32 to vector<1x32xf32>
    %239 = arith.addf %238, %237 : vector<1x32xf32>
    %cst_98 = arith.constant 1.000000e+00 : f32
    %240 = vector.broadcast %cst_98 : f32 to vector<1x32xf32>
    %241 = arith.divf %240, %239 : vector<1x32xf32>
    %242 = arith.mulf %231, %165 : vector<1x32xf32>
    %243 = arith.mulf %223, %233 : vector<1x32xf32>
    %244 = arith.addf %242, %243 : vector<1x32xf32>
    %245 = math.tanh %244 : vector<1x32xf32>
    %246 = arith.mulf %241, %245 : vector<1x32xf32>
    %247 = vector.shape_cast %215 : vector<1x32xf32> to vector<1x1x32xf32>
    %c0_99 = arith.constant 0 : index
    %248 = arith.index_cast %c2_i32 : i32 to index
    %c0_100 = arith.constant 0 : index
    %249 = vector.load %arg11[%c0_99, %248, %c0_100] : memref<1x8x32xf32, #tpu.memory_space<vmem>>, vector<1x1x32xf32>
    tpu.vector_store %arg11[%c0_99, %248, %c0_100], %247 {strides = array<i32>} : memref<1x8x32xf32, #tpu.memory_space<vmem>>, vector<1x1x32xf32>,
    %250 = vector.shape_cast %246 : vector<1x32xf32> to vector<1x1x32xf32>
    %c0_101 = arith.constant 0 : index
    %251 = arith.index_cast %174 : i32 to index
    %c0_102 = arith.constant 0 : index
    %252 = vector.load %arg12[%c0_101, %251, %c0_102] : memref<1x8x32xf32, #tpu.memory_space<vmem>>, vector<1x1x32xf32>
    tpu.vector_store %arg12[%c0_101, %251, %c0_102], %250 {strides = array<i32>} : memref<1x8x32xf32, #tpu.memory_space<vmem>>, vector<1x1x32xf32>,
    %c3_i32 = arith.constant 3 : i32
    %c7_i32_103 = arith.constant 7 : i32
    %253 = arith.subi %c7_i32_103, %c3_i32 : i32
    %c0_104 = arith.constant 0 : index
    %254 = arith.index_cast %c3_i32 : i32 to index
    %c0_105 = arith.constant 0 : index
    %255 = vector.load %arg9[%c0_104, %254, %c0_105] : memref<1x8x128xf32, #tpu.memory_space<vmem>>, vector<1x1x128xf32>
    %256 = vector.shape_cast %255 : vector<1x1x128xf32> to vector<1x128xf32>
    %cst_106 = arith.constant dense<0.000000e+00> : vector<1x128xf32>
    %257 = tpu.matmul %215, %13, %cst_106 {dimension_numbers = #tpu.dot_dimension_numbers<[1], [0], [0], [1], [0, 0, 1, 1], [], []>} : vector<1x32xf32>, vector<32x128xf32>, vector<1x128xf32> -> vector<1x128xf32>
    %258 = arith.addf %256, %257 : vector<1x128xf32>
    %c0_107 = arith.constant 0 : index
    %259 = arith.index_cast %253 : i32 to index
    %c0_108 = arith.constant 0 : index
    %260 = vector.load %arg10[%c0_107, %259, %c0_108] : memref<1x8x128xf32, #tpu.memory_space<vmem>>, vector<1x1x128xf32>
    %261 = vector.shape_cast %260 : vector<1x1x128xf32> to vector<1x128xf32>
    %cst_109 = arith.constant dense<0.000000e+00> : vector<1x128xf32>
    %262 = tpu.matmul %246, %14, %cst_109 {dimension_numbers = #tpu.dot_dimension_numbers<[1], [0], [0], [1], [0, 0, 1, 1], [], []>} : vector<1x32xf32>, vector<32x128xf32>, vector<1x128xf32> -> vector<1x128xf32>
    %263 = arith.addf %261, %262 : vector<1x128xf32>
    %264 = vector.extract_strided_slice %258 {offsets = [0, 0], sizes = [1, 32], strides = [1, 1]} : vector<1x128xf32> to vector<1x32xf32>
    %cst_110 = arith.constant 0.000000e+00 : f32
    %265 = vector.broadcast %cst_110 : f32 to vector<1x32xf32>
    %266 = arith.subf %265, %264 : vector<1x32xf32>
    %267 = math.exp %266 : vector<1x32xf32>
    %cst_111 = arith.constant 1.000000e+00 : f32
    %268 = vector.broadcast %cst_111 : f32 to vector<1x32xf32>
    %269 = arith.addf %268, %267 : vector<1x32xf32>
    %cst_112 = arith.constant 1.000000e+00 : f32
    %270 = vector.broadcast %cst_112 : f32 to vector<1x32xf32>
    %271 = arith.divf %270, %269 : vector<1x32xf32>
    %272 = vector.extract_strided_slice %258 {offsets = [0, 32], sizes = [1, 32], strides = [1, 1]} : vector<1x128xf32> to vector<1x32xf32>
    %cst_113 = arith.constant 0.000000e+00 : f32
    %273 = vector.broadcast %cst_113 : f32 to vector<1x32xf32>
    %274 = arith.subf %273, %272 : vector<1x32xf32>
    %275 = math.exp %274 : vector<1x32xf32>
    %cst_114 = arith.constant 1.000000e+00 : f32
    %276 = vector.broadcast %cst_114 : f32 to vector<1x32xf32>
    %277 = arith.addf %276, %275 : vector<1x32xf32>
    %cst_115 = arith.constant 1.000000e+00 : f32
    %278 = vector.broadcast %cst_115 : f32 to vector<1x32xf32>
    %279 = arith.divf %278, %277 : vector<1x32xf32>
    %280 = vector.extract_strided_slice %258 {offsets = [0, 64], sizes = [1, 32], strides = [1, 1]} : vector<1x128xf32> to vector<1x32xf32>
    %281 = math.tanh %280 : vector<1x32xf32>
    %282 = vector.extract_strided_slice %258 {offsets = [0, 96], sizes = [1, 32], strides = [1, 1]} : vector<1x128xf32> to vector<1x32xf32>
    %cst_116 = arith.constant 0.000000e+00 : f32
    %283 = vector.broadcast %cst_116 : f32 to vector<1x32xf32>
    %284 = arith.subf %283, %282 : vector<1x32xf32>
    %285 = math.exp %284 : vector<1x32xf32>
    %cst_117 = arith.constant 1.000000e+00 : f32
    %286 = vector.broadcast %cst_117 : f32 to vector<1x32xf32>
    %287 = arith.addf %286, %285 : vector<1x32xf32>
    %cst_118 = arith.constant 1.000000e+00 : f32
    %288 = vector.broadcast %cst_118 : f32 to vector<1x32xf32>
    %289 = arith.divf %288, %287 : vector<1x32xf32>
    %290 = arith.mulf %279, %213 : vector<1x32xf32>
    %291 = arith.mulf %271, %281 : vector<1x32xf32>
    %292 = arith.addf %290, %291 : vector<1x32xf32>
    %293 = math.tanh %292 : vector<1x32xf32>
    %294 = arith.mulf %289, %293 : vector<1x32xf32>
    %295 = vector.extract_strided_slice %263 {offsets = [0, 0], sizes = [1, 32], strides = [1, 1]} : vector<1x128xf32> to vector<1x32xf32>
    %cst_119 = arith.constant 0.000000e+00 : f32
    %296 = vector.broadcast %cst_119 : f32 to vector<1x32xf32>
    %297 = arith.subf %296, %295 : vector<1x32xf32>
    %298 = math.exp %297 : vector<1x32xf32>
    %cst_120 = arith.constant 1.000000e+00 : f32
    %299 = vector.broadcast %cst_120 : f32 to vector<1x32xf32>
    %300 = arith.addf %299, %298 : vector<1x32xf32>
    %cst_121 = arith.constant 1.000000e+00 : f32
    %301 = vector.broadcast %cst_121 : f32 to vector<1x32xf32>
    %302 = arith.divf %301, %300 : vector<1x32xf32>
    %303 = vector.extract_strided_slice %263 {offsets = [0, 32], sizes = [1, 32], strides = [1, 1]} : vector<1x128xf32> to vector<1x32xf32>
    %cst_122 = arith.constant 0.000000e+00 : f32
    %304 = vector.broadcast %cst_122 : f32 to vector<1x32xf32>
    %305 = arith.subf %304, %303 : vector<1x32xf32>
    %306 = math.exp %305 : vector<1x32xf32>
    %cst_123 = arith.constant 1.000000e+00 : f32
    %307 = vector.broadcast %cst_123 : f32 to vector<1x32xf32>
    %308 = arith.addf %307, %306 : vector<1x32xf32>
    %cst_124 = arith.constant 1.000000e+00 : f32
    %309 = vector.broadcast %cst_124 : f32 to vector<1x32xf32>
    %310 = arith.divf %309, %308 : vector<1x32xf32>
    %311 = vector.extract_strided_slice %263 {offsets = [0, 64], sizes = [1, 32], strides = [1, 1]} : vector<1x128xf32> to vector<1x32xf32>
    %312 = math.tanh %311 : vector<1x32xf32>
    %313 = vector.extract_strided_slice %263 {offsets = [0, 96], sizes = [1, 32], strides = [1, 1]} : vector<1x128xf32> to vector<1x32xf32>
    %cst_125 = arith.constant 0.000000e+00 : f32
    %314 = vector.broadcast %cst_125 : f32 to vector<1x32xf32>
    %315 = arith.subf %314, %313 : vector<1x32xf32>
    %316 = math.exp %315 : vector<1x32xf32>
    %cst_126 = arith.constant 1.000000e+00 : f32
    %317 = vector.broadcast %cst_126 : f32 to vector<1x32xf32>
    %318 = arith.addf %317, %316 : vector<1x32xf32>
    %cst_127 = arith.constant 1.000000e+00 : f32
    %319 = vector.broadcast %cst_127 : f32 to vector<1x32xf32>
    %320 = arith.divf %319, %318 : vector<1x32xf32>
    %321 = arith.mulf %310, %244 : vector<1x32xf32>
    %322 = arith.mulf %302, %312 : vector<1x32xf32>
    %323 = arith.addf %321, %322 : vector<1x32xf32>
    %324 = math.tanh %323 : vector<1x32xf32>
    %325 = arith.mulf %320, %324 : vector<1x32xf32>
    %326 = vector.shape_cast %294 : vector<1x32xf32> to vector<1x1x32xf32>
    %c0_128 = arith.constant 0 : index
    %327 = arith.index_cast %c3_i32 : i32 to index
    %c0_129 = arith.constant 0 : index
    %328 = vector.load %arg11[%c0_128, %327, %c0_129] : memref<1x8x32xf32, #tpu.memory_space<vmem>>, vector<1x1x32xf32>
    tpu.vector_store %arg11[%c0_128, %327, %c0_129], %326 {strides = array<i32>} : memref<1x8x32xf32, #tpu.memory_space<vmem>>, vector<1x1x32xf32>,
    %329 = vector.shape_cast %325 : vector<1x32xf32> to vector<1x1x32xf32>
    %c0_130 = arith.constant 0 : index
    %330 = arith.index_cast %253 : i32 to index
    %c0_131 = arith.constant 0 : index
    %331 = vector.load %arg12[%c0_130, %330, %c0_131] : memref<1x8x32xf32, #tpu.memory_space<vmem>>, vector<1x1x32xf32>
    tpu.vector_store %arg12[%c0_130, %330, %c0_131], %329 {strides = array<i32>} : memref<1x8x32xf32, #tpu.memory_space<vmem>>, vector<1x1x32xf32>,
    %c4_i32 = arith.constant 4 : i32
    %c7_i32_132 = arith.constant 7 : i32
    %332 = arith.subi %c7_i32_132, %c4_i32 : i32
    %c0_133 = arith.constant 0 : index
    %333 = arith.index_cast %c4_i32 : i32 to index
    %c0_134 = arith.constant 0 : index
    %334 = vector.load %arg9[%c0_133, %333, %c0_134] : memref<1x8x128xf32, #tpu.memory_space<vmem>>, vector<1x1x128xf32>
    %335 = vector.shape_cast %334 : vector<1x1x128xf32> to vector<1x128xf32>
    %cst_135 = arith.constant dense<0.000000e+00> : vector<1x128xf32>
    %336 = tpu.matmul %294, %13, %cst_135 {dimension_numbers = #tpu.dot_dimension_numbers<[1], [0], [0], [1], [0, 0, 1, 1], [], []>} : vector<1x32xf32>, vector<32x128xf32>, vector<1x128xf32> -> vector<1x128xf32>
    %337 = arith.addf %335, %336 : vector<1x128xf32>
    %c0_136 = arith.constant 0 : index
    %338 = arith.index_cast %332 : i32 to index
    %c0_137 = arith.constant 0 : index
    %339 = vector.load %arg10[%c0_136, %338, %c0_137] : memref<1x8x128xf32, #tpu.memory_space<vmem>>, vector<1x1x128xf32>
    %340 = vector.shape_cast %339 : vector<1x1x128xf32> to vector<1x128xf32>
    %cst_138 = arith.constant dense<0.000000e+00> : vector<1x128xf32>
    %341 = tpu.matmul %325, %14, %cst_138 {dimension_numbers = #tpu.dot_dimension_numbers<[1], [0], [0], [1], [0, 0, 1, 1], [], []>} : vector<1x32xf32>, vector<32x128xf32>, vector<1x128xf32> -> vector<1x128xf32>
    %342 = arith.addf %340, %341 : vector<1x128xf32>
    %343 = vector.extract_strided_slice %337 {offsets = [0, 0], sizes = [1, 32], strides = [1, 1]} : vector<1x128xf32> to vector<1x32xf32>
    %cst_139 = arith.constant 0.000000e+00 : f32
    %344 = vector.broadcast %cst_139 : f32 to vector<1x32xf32>
    %345 = arith.subf %344, %343 : vector<1x32xf32>
    %346 = math.exp %345 : vector<1x32xf32>
    %cst_140 = arith.constant 1.000000e+00 : f32
    %347 = vector.broadcast %cst_140 : f32 to vector<1x32xf32>
    %348 = arith.addf %347, %346 : vector<1x32xf32>
    %cst_141 = arith.constant 1.000000e+00 : f32
    %349 = vector.broadcast %cst_141 : f32 to vector<1x32xf32>
    %350 = arith.divf %349, %348 : vector<1x32xf32>
    %351 = vector.extract_strided_slice %337 {offsets = [0, 32], sizes = [1, 32], strides = [1, 1]} : vector<1x128xf32> to vector<1x32xf32>
    %cst_142 = arith.constant 0.000000e+00 : f32
    %352 = vector.broadcast %cst_142 : f32 to vector<1x32xf32>
    %353 = arith.subf %352, %351 : vector<1x32xf32>
    %354 = math.exp %353 : vector<1x32xf32>
    %cst_143 = arith.constant 1.000000e+00 : f32
    %355 = vector.broadcast %cst_143 : f32 to vector<1x32xf32>
    %356 = arith.addf %355, %354 : vector<1x32xf32>
    %cst_144 = arith.constant 1.000000e+00 : f32
    %357 = vector.broadcast %cst_144 : f32 to vector<1x32xf32>
    %358 = arith.divf %357, %356 : vector<1x32xf32>
    %359 = vector.extract_strided_slice %337 {offsets = [0, 64], sizes = [1, 32], strides = [1, 1]} : vector<1x128xf32> to vector<1x32xf32>
    %360 = math.tanh %359 : vector<1x32xf32>
    %361 = vector.extract_strided_slice %337 {offsets = [0, 96], sizes = [1, 32], strides = [1, 1]} : vector<1x128xf32> to vector<1x32xf32>
    %cst_145 = arith.constant 0.000000e+00 : f32
    %362 = vector.broadcast %cst_145 : f32 to vector<1x32xf32>
    %363 = arith.subf %362, %361 : vector<1x32xf32>
    %364 = math.exp %363 : vector<1x32xf32>
    %cst_146 = arith.constant 1.000000e+00 : f32
    %365 = vector.broadcast %cst_146 : f32 to vector<1x32xf32>
    %366 = arith.addf %365, %364 : vector<1x32xf32>
    %cst_147 = arith.constant 1.000000e+00 : f32
    %367 = vector.broadcast %cst_147 : f32 to vector<1x32xf32>
    %368 = arith.divf %367, %366 : vector<1x32xf32>
    %369 = arith.mulf %358, %292 : vector<1x32xf32>
    %370 = arith.mulf %350, %360 : vector<1x32xf32>
    %371 = arith.addf %369, %370 : vector<1x32xf32>
    %372 = math.tanh %371 : vector<1x32xf32>
    %373 = arith.mulf %368, %372 : vector<1x32xf32>
    %374 = vector.extract_strided_slice %342 {offsets = [0, 0], sizes = [1, 32], strides = [1, 1]} : vector<1x128xf32> to vector<1x32xf32>
    %cst_148 = arith.constant 0.000000e+00 : f32
    %375 = vector.broadcast %cst_148 : f32 to vector<1x32xf32>
    %376 = arith.subf %375, %374 : vector<1x32xf32>
    %377 = math.exp %376 : vector<1x32xf32>
    %cst_149 = arith.constant 1.000000e+00 : f32
    %378 = vector.broadcast %cst_149 : f32 to vector<1x32xf32>
    %379 = arith.addf %378, %377 : vector<1x32xf32>
    %cst_150 = arith.constant 1.000000e+00 : f32
    %380 = vector.broadcast %cst_150 : f32 to vector<1x32xf32>
    %381 = arith.divf %380, %379 : vector<1x32xf32>
    %382 = vector.extract_strided_slice %342 {offsets = [0, 32], sizes = [1, 32], strides = [1, 1]} : vector<1x128xf32> to vector<1x32xf32>
    %cst_151 = arith.constant 0.000000e+00 : f32
    %383 = vector.broadcast %cst_151 : f32 to vector<1x32xf32>
    %384 = arith.subf %383, %382 : vector<1x32xf32>
    %385 = math.exp %384 : vector<1x32xf32>
    %cst_152 = arith.constant 1.000000e+00 : f32
    %386 = vector.broadcast %cst_152 : f32 to vector<1x32xf32>
    %387 = arith.addf %386, %385 : vector<1x32xf32>
    %cst_153 = arith.constant 1.000000e+00 : f32
    %388 = vector.broadcast %cst_153 : f32 to vector<1x32xf32>
    %389 = arith.divf %388, %387 : vector<1x32xf32>
    %390 = vector.extract_strided_slice %342 {offsets = [0, 64], sizes = [1, 32], strides = [1, 1]} : vector<1x128xf32> to vector<1x32xf32>
    %391 = math.tanh %390 : vector<1x32xf32>
    %392 = vector.extract_strided_slice %342 {offsets = [0, 96], sizes = [1, 32], strides = [1, 1]} : vector<1x128xf32> to vector<1x32xf32>
    %cst_154 = arith.constant 0.000000e+00 : f32
    %393 = vector.broadcast %cst_154 : f32 to vector<1x32xf32>
    %394 = arith.subf %393, %392 : vector<1x32xf32>
    %395 = math.exp %394 : vector<1x32xf32>
    %cst_155 = arith.constant 1.000000e+00 : f32
    %396 = vector.broadcast %cst_155 : f32 to vector<1x32xf32>
    %397 = arith.addf %396, %395 : vector<1x32xf32>
    %cst_156 = arith.constant 1.000000e+00 : f32
    %398 = vector.broadcast %cst_156 : f32 to vector<1x32xf32>
    %399 = arith.divf %398, %397 : vector<1x32xf32>
    %400 = arith.mulf %389, %323 : vector<1x32xf32>
    %401 = arith.mulf %381, %391 : vector<1x32xf32>
    %402 = arith.addf %400, %401 : vector<1x32xf32>
    %403 = math.tanh %402 : vector<1x32xf32>
    %404 = arith.mulf %399, %403 : vector<1x32xf32>
    %405 = vector.shape_cast %373 : vector<1x32xf32> to vector<1x1x32xf32>
    %c0_157 = arith.constant 0 : index
    %406 = arith.index_cast %c4_i32 : i32 to index
    %c0_158 = arith.constant 0 : index
    %407 = vector.load %arg11[%c0_157, %406, %c0_158] : memref<1x8x32xf32, #tpu.memory_space<vmem>>, vector<1x1x32xf32>
    tpu.vector_store %arg11[%c0_157, %406, %c0_158], %405 {strides = array<i32>} : memref<1x8x32xf32, #tpu.memory_space<vmem>>, vector<1x1x32xf32>,
    %408 = vector.shape_cast %404 : vector<1x32xf32> to vector<1x1x32xf32>
    %c0_159 = arith.constant 0 : index
    %409 = arith.index_cast %332 : i32 to index
    %c0_160 = arith.constant 0 : index
    %410 = vector.load %arg12[%c0_159, %409, %c0_160] : memref<1x8x32xf32, #tpu.memory_space<vmem>>, vector<1x1x32xf32>
    tpu.vector_store %arg12[%c0_159, %409, %c0_160], %408 {strides = array<i32>} : memref<1x8x32xf32, #tpu.memory_space<vmem>>, vector<1x1x32xf32>,
    %c5_i32 = arith.constant 5 : i32
    %c7_i32_161 = arith.constant 7 : i32
    %411 = arith.subi %c7_i32_161, %c5_i32 : i32
    %c0_162 = arith.constant 0 : index
    %412 = arith.index_cast %c5_i32 : i32 to index
    %c0_163 = arith.constant 0 : index
    %413 = vector.load %arg9[%c0_162, %412, %c0_163] : memref<1x8x128xf32, #tpu.memory_space<vmem>>, vector<1x1x128xf32>
    %414 = vector.shape_cast %413 : vector<1x1x128xf32> to vector<1x128xf32>
    %cst_164 = arith.constant dense<0.000000e+00> : vector<1x128xf32>
    %415 = tpu.matmul %373, %13, %cst_164 {dimension_numbers = #tpu.dot_dimension_numbers<[1], [0], [0], [1], [0, 0, 1, 1], [], []>} : vector<1x32xf32>, vector<32x128xf32>, vector<1x128xf32> -> vector<1x128xf32>
    %416 = arith.addf %414, %415 : vector<1x128xf32>
    %c0_165 = arith.constant 0 : index
    %417 = arith.index_cast %411 : i32 to index
    %c0_166 = arith.constant 0 : index
    %418 = vector.load %arg10[%c0_165, %417, %c0_166] : memref<1x8x128xf32, #tpu.memory_space<vmem>>, vector<1x1x128xf32>
    %419 = vector.shape_cast %418 : vector<1x1x128xf32> to vector<1x128xf32>
    %cst_167 = arith.constant dense<0.000000e+00> : vector<1x128xf32>
    %420 = tpu.matmul %404, %14, %cst_167 {dimension_numbers = #tpu.dot_dimension_numbers<[1], [0], [0], [1], [0, 0, 1, 1], [], []>} : vector<1x32xf32>, vector<32x128xf32>, vector<1x128xf32> -> vector<1x128xf32>
    %421 = arith.addf %419, %420 : vector<1x128xf32>
    %422 = vector.extract_strided_slice %416 {offsets = [0, 0], sizes = [1, 32], strides = [1, 1]} : vector<1x128xf32> to vector<1x32xf32>
    %cst_168 = arith.constant 0.000000e+00 : f32
    %423 = vector.broadcast %cst_168 : f32 to vector<1x32xf32>
    %424 = arith.subf %423, %422 : vector<1x32xf32>
    %425 = math.exp %424 : vector<1x32xf32>
    %cst_169 = arith.constant 1.000000e+00 : f32
    %426 = vector.broadcast %cst_169 : f32 to vector<1x32xf32>
    %427 = arith.addf %426, %425 : vector<1x32xf32>
    %cst_170 = arith.constant 1.000000e+00 : f32
    %428 = vector.broadcast %cst_170 : f32 to vector<1x32xf32>
    %429 = arith.divf %428, %427 : vector<1x32xf32>
    %430 = vector.extract_strided_slice %416 {offsets = [0, 32], sizes = [1, 32], strides = [1, 1]} : vector<1x128xf32> to vector<1x32xf32>
    %cst_171 = arith.constant 0.000000e+00 : f32
    %431 = vector.broadcast %cst_171 : f32 to vector<1x32xf32>
    %432 = arith.subf %431, %430 : vector<1x32xf32>
    %433 = math.exp %432 : vector<1x32xf32>
    %cst_172 = arith.constant 1.000000e+00 : f32
    %434 = vector.broadcast %cst_172 : f32 to vector<1x32xf32>
    %435 = arith.addf %434, %433 : vector<1x32xf32>
    %cst_173 = arith.constant 1.000000e+00 : f32
    %436 = vector.broadcast %cst_173 : f32 to vector<1x32xf32>
    %437 = arith.divf %436, %435 : vector<1x32xf32>
    %438 = vector.extract_strided_slice %416 {offsets = [0, 64], sizes = [1, 32], strides = [1, 1]} : vector<1x128xf32> to vector<1x32xf32>
    %439 = math.tanh %438 : vector<1x32xf32>
    %440 = vector.extract_strided_slice %416 {offsets = [0, 96], sizes = [1, 32], strides = [1, 1]} : vector<1x128xf32> to vector<1x32xf32>
    %cst_174 = arith.constant 0.000000e+00 : f32
    %441 = vector.broadcast %cst_174 : f32 to vector<1x32xf32>
    %442 = arith.subf %441, %440 : vector<1x32xf32>
    %443 = math.exp %442 : vector<1x32xf32>
    %cst_175 = arith.constant 1.000000e+00 : f32
    %444 = vector.broadcast %cst_175 : f32 to vector<1x32xf32>
    %445 = arith.addf %444, %443 : vector<1x32xf32>
    %cst_176 = arith.constant 1.000000e+00 : f32
    %446 = vector.broadcast %cst_176 : f32 to vector<1x32xf32>
    %447 = arith.divf %446, %445 : vector<1x32xf32>
    %448 = arith.mulf %437, %371 : vector<1x32xf32>
    %449 = arith.mulf %429, %439 : vector<1x32xf32>
    %450 = arith.addf %448, %449 : vector<1x32xf32>
    %451 = math.tanh %450 : vector<1x32xf32>
    %452 = arith.mulf %447, %451 : vector<1x32xf32>
    %453 = vector.extract_strided_slice %421 {offsets = [0, 0], sizes = [1, 32], strides = [1, 1]} : vector<1x128xf32> to vector<1x32xf32>
    %cst_177 = arith.constant 0.000000e+00 : f32
    %454 = vector.broadcast %cst_177 : f32 to vector<1x32xf32>
    %455 = arith.subf %454, %453 : vector<1x32xf32>
    %456 = math.exp %455 : vector<1x32xf32>
    %cst_178 = arith.constant 1.000000e+00 : f32
    %457 = vector.broadcast %cst_178 : f32 to vector<1x32xf32>
    %458 = arith.addf %457, %456 : vector<1x32xf32>
    %cst_179 = arith.constant 1.000000e+00 : f32
    %459 = vector.broadcast %cst_179 : f32 to vector<1x32xf32>
    %460 = arith.divf %459, %458 : vector<1x32xf32>
    %461 = vector.extract_strided_slice %421 {offsets = [0, 32], sizes = [1, 32], strides = [1, 1]} : vector<1x128xf32> to vector<1x32xf32>
    %cst_180 = arith.constant 0.000000e+00 : f32
    %462 = vector.broadcast %cst_180 : f32 to vector<1x32xf32>
    %463 = arith.subf %462, %461 : vector<1x32xf32>
    %464 = math.exp %463 : vector<1x32xf32>
    %cst_181 = arith.constant 1.000000e+00 : f32
    %465 = vector.broadcast %cst_181 : f32 to vector<1x32xf32>
    %466 = arith.addf %465, %464 : vector<1x32xf32>
    %cst_182 = arith.constant 1.000000e+00 : f32
    %467 = vector.broadcast %cst_182 : f32 to vector<1x32xf32>
    %468 = arith.divf %467, %466 : vector<1x32xf32>
    %469 = vector.extract_strided_slice %421 {offsets = [0, 64], sizes = [1, 32], strides = [1, 1]} : vector<1x128xf32> to vector<1x32xf32>
    %470 = math.tanh %469 : vector<1x32xf32>
    %471 = vector.extract_strided_slice %421 {offsets = [0, 96], sizes = [1, 32], strides = [1, 1]} : vector<1x128xf32> to vector<1x32xf32>
    %cst_183 = arith.constant 0.000000e+00 : f32
    %472 = vector.broadcast %cst_183 : f32 to vector<1x32xf32>
    %473 = arith.subf %472, %471 : vector<1x32xf32>
    %474 = math.exp %473 : vector<1x32xf32>
    %cst_184 = arith.constant 1.000000e+00 : f32
    %475 = vector.broadcast %cst_184 : f32 to vector<1x32xf32>
    %476 = arith.addf %475, %474 : vector<1x32xf32>
    %cst_185 = arith.constant 1.000000e+00 : f32
    %477 = vector.broadcast %cst_185 : f32 to vector<1x32xf32>
    %478 = arith.divf %477, %476 : vector<1x32xf32>
    %479 = arith.mulf %468, %402 : vector<1x32xf32>
    %480 = arith.mulf %460, %470 : vector<1x32xf32>
    %481 = arith.addf %479, %480 : vector<1x32xf32>
    %482 = math.tanh %481 : vector<1x32xf32>
    %483 = arith.mulf %478, %482 : vector<1x32xf32>
    %484 = vector.shape_cast %452 : vector<1x32xf32> to vector<1x1x32xf32>
    %c0_186 = arith.constant 0 : index
    %485 = arith.index_cast %c5_i32 : i32 to index
    %c0_187 = arith.constant 0 : index
    %486 = vector.load %arg11[%c0_186, %485, %c0_187] : memref<1x8x32xf32, #tpu.memory_space<vmem>>, vector<1x1x32xf32>
    tpu.vector_store %arg11[%c0_186, %485, %c0_187], %484 {strides = array<i32>} : memref<1x8x32xf32, #tpu.memory_space<vmem>>, vector<1x1x32xf32>,
    %487 = vector.shape_cast %483 : vector<1x32xf32> to vector<1x1x32xf32>
    %c0_188 = arith.constant 0 : index
    %488 = arith.index_cast %411 : i32 to index
    %c0_189 = arith.constant 0 : index
    %489 = vector.load %arg12[%c0_188, %488, %c0_189] : memref<1x8x32xf32, #tpu.memory_space<vmem>>, vector<1x1x32xf32>
    tpu.vector_store %arg12[%c0_188, %488, %c0_189], %487 {strides = array<i32>} : memref<1x8x32xf32, #tpu.memory_space<vmem>>, vector<1x1x32xf32>,
    %c6_i32 = arith.constant 6 : i32
    %c7_i32_190 = arith.constant 7 : i32
    %490 = arith.subi %c7_i32_190, %c6_i32 : i32
    %c0_191 = arith.constant 0 : index
    %491 = arith.index_cast %c6_i32 : i32 to index
    %c0_192 = arith.constant 0 : index
    %492 = vector.load %arg9[%c0_191, %491, %c0_192] : memref<1x8x128xf32, #tpu.memory_space<vmem>>, vector<1x1x128xf32>
    %493 = vector.shape_cast %492 : vector<1x1x128xf32> to vector<1x128xf32>
    %cst_193 = arith.constant dense<0.000000e+00> : vector<1x128xf32>
    %494 = tpu.matmul %452, %13, %cst_193 {dimension_numbers = #tpu.dot_dimension_numbers<[1], [0], [0], [1], [0, 0, 1, 1], [], []>} : vector<1x32xf32>, vector<32x128xf32>, vector<1x128xf32> -> vector<1x128xf32>
    %495 = arith.addf %493, %494 : vector<1x128xf32>
    %c0_194 = arith.constant 0 : index
    %496 = arith.index_cast %490 : i32 to index
    %c0_195 = arith.constant 0 : index
    %497 = vector.load %arg10[%c0_194, %496, %c0_195] : memref<1x8x128xf32, #tpu.memory_space<vmem>>, vector<1x1x128xf32>
    %498 = vector.shape_cast %497 : vector<1x1x128xf32> to vector<1x128xf32>
    %cst_196 = arith.constant dense<0.000000e+00> : vector<1x128xf32>
    %499 = tpu.matmul %483, %14, %cst_196 {dimension_numbers = #tpu.dot_dimension_numbers<[1], [0], [0], [1], [0, 0, 1, 1], [], []>} : vector<1x32xf32>, vector<32x128xf32>, vector<1x128xf32> -> vector<1x128xf32>
    %500 = arith.addf %498, %499 : vector<1x128xf32>
    %501 = vector.extract_strided_slice %495 {offsets = [0, 0], sizes = [1, 32], strides = [1, 1]} : vector<1x128xf32> to vector<1x32xf32>
    %cst_197 = arith.constant 0.000000e+00 : f32
    %502 = vector.broadcast %cst_197 : f32 to vector<1x32xf32>
    %503 = arith.subf %502, %501 : vector<1x32xf32>
    %504 = math.exp %503 : vector<1x32xf32>
    %cst_198 = arith.constant 1.000000e+00 : f32
    %505 = vector.broadcast %cst_198 : f32 to vector<1x32xf32>
    %506 = arith.addf %505, %504 : vector<1x32xf32>
    %cst_199 = arith.constant 1.000000e+00 : f32
    %507 = vector.broadcast %cst_199 : f32 to vector<1x32xf32>
    %508 = arith.divf %507, %506 : vector<1x32xf32>
    %509 = vector.extract_strided_slice %495 {offsets = [0, 32], sizes = [1, 32], strides = [1, 1]} : vector<1x128xf32> to vector<1x32xf32>
    %cst_200 = arith.constant 0.000000e+00 : f32
    %510 = vector.broadcast %cst_200 : f32 to vector<1x32xf32>
    %511 = arith.subf %510, %509 : vector<1x32xf32>
    %512 = math.exp %511 : vector<1x32xf32>
    %cst_201 = arith.constant 1.000000e+00 : f32
    %513 = vector.broadcast %cst_201 : f32 to vector<1x32xf32>
    %514 = arith.addf %513, %512 : vector<1x32xf32>
    %cst_202 = arith.constant 1.000000e+00 : f32
    %515 = vector.broadcast %cst_202 : f32 to vector<1x32xf32>
    %516 = arith.divf %515, %514 : vector<1x32xf32>
    %517 = vector.extract_strided_slice %495 {offsets = [0, 64], sizes = [1, 32], strides = [1, 1]} : vector<1x128xf32> to vector<1x32xf32>
    %518 = math.tanh %517 : vector<1x32xf32>
    %519 = vector.extract_strided_slice %495 {offsets = [0, 96], sizes = [1, 32], strides = [1, 1]} : vector<1x128xf32> to vector<1x32xf32>
    %cst_203 = arith.constant 0.000000e+00 : f32
    %520 = vector.broadcast %cst_203 : f32 to vector<1x32xf32>
    %521 = arith.subf %520, %519 : vector<1x32xf32>
    %522 = math.exp %521 : vector<1x32xf32>
    %cst_204 = arith.constant 1.000000e+00 : f32
    %523 = vector.broadcast %cst_204 : f32 to vector<1x32xf32>
    %524 = arith.addf %523, %522 : vector<1x32xf32>
    %cst_205 = arith.constant 1.000000e+00 : f32
    %525 = vector.broadcast %cst_205 : f32 to vector<1x32xf32>
    %526 = arith.divf %525, %524 : vector<1x32xf32>
    %527 = arith.mulf %516, %450 : vector<1x32xf32>
    %528 = arith.mulf %508, %518 : vector<1x32xf32>
    %529 = arith.addf %527, %528 : vector<1x32xf32>
    %530 = math.tanh %529 : vector<1x32xf32>
    %531 = arith.mulf %526, %530 : vector<1x32xf32>
    %532 = vector.extract_strided_slice %500 {offsets = [0, 0], sizes = [1, 32], strides = [1, 1]} : vector<1x128xf32> to vector<1x32xf32>
    %cst_206 = arith.constant 0.000000e+00 : f32
    %533 = vector.broadcast %cst_206 : f32 to vector<1x32xf32>
    %534 = arith.subf %533, %532 : vector<1x32xf32>
    %535 = math.exp %534 : vector<1x32xf32>
    %cst_207 = arith.constant 1.000000e+00 : f32
    %536 = vector.broadcast %cst_207 : f32 to vector<1x32xf32>
    %537 = arith.addf %536, %535 : vector<1x32xf32>
    %cst_208 = arith.constant 1.000000e+00 : f32
    %538 = vector.broadcast %cst_208 : f32 to vector<1x32xf32>
    %539 = arith.divf %538, %537 : vector<1x32xf32>
    %540 = vector.extract_strided_slice %500 {offsets = [0, 32], sizes = [1, 32], strides = [1, 1]} : vector<1x128xf32> to vector<1x32xf32>
    %cst_209 = arith.constant 0.000000e+00 : f32
    %541 = vector.broadcast %cst_209 : f32 to vector<1x32xf32>
    %542 = arith.subf %541, %540 : vector<1x32xf32>
    %543 = math.exp %542 : vector<1x32xf32>
    %cst_210 = arith.constant 1.000000e+00 : f32
    %544 = vector.broadcast %cst_210 : f32 to vector<1x32xf32>
    %545 = arith.addf %544, %543 : vector<1x32xf32>
    %cst_211 = arith.constant 1.000000e+00 : f32
    %546 = vector.broadcast %cst_211 : f32 to vector<1x32xf32>
    %547 = arith.divf %546, %545 : vector<1x32xf32>
    %548 = vector.extract_strided_slice %500 {offsets = [0, 64], sizes = [1, 32], strides = [1, 1]} : vector<1x128xf32> to vector<1x32xf32>
    %549 = math.tanh %548 : vector<1x32xf32>
    %550 = vector.extract_strided_slice %500 {offsets = [0, 96], sizes = [1, 32], strides = [1, 1]} : vector<1x128xf32> to vector<1x32xf32>
    %cst_212 = arith.constant 0.000000e+00 : f32
    %551 = vector.broadcast %cst_212 : f32 to vector<1x32xf32>
    %552 = arith.subf %551, %550 : vector<1x32xf32>
    %553 = math.exp %552 : vector<1x32xf32>
    %cst_213 = arith.constant 1.000000e+00 : f32
    %554 = vector.broadcast %cst_213 : f32 to vector<1x32xf32>
    %555 = arith.addf %554, %553 : vector<1x32xf32>
    %cst_214 = arith.constant 1.000000e+00 : f32
    %556 = vector.broadcast %cst_214 : f32 to vector<1x32xf32>
    %557 = arith.divf %556, %555 : vector<1x32xf32>
    %558 = arith.mulf %547, %481 : vector<1x32xf32>
    %559 = arith.mulf %539, %549 : vector<1x32xf32>
    %560 = arith.addf %558, %559 : vector<1x32xf32>
    %561 = math.tanh %560 : vector<1x32xf32>
    %562 = arith.mulf %557, %561 : vector<1x32xf32>
    %563 = vector.shape_cast %531 : vector<1x32xf32> to vector<1x1x32xf32>
    %c0_215 = arith.constant 0 : index
    %564 = arith.index_cast %c6_i32 : i32 to index
    %c0_216 = arith.constant 0 : index
    %565 = vector.load %arg11[%c0_215, %564, %c0_216] : memref<1x8x32xf32, #tpu.memory_space<vmem>>, vector<1x1x32xf32>
    tpu.vector_store %arg11[%c0_215, %564, %c0_216], %563 {strides = array<i32>} : memref<1x8x32xf32, #tpu.memory_space<vmem>>, vector<1x1x32xf32>,
    %566 = vector.shape_cast %562 : vector<1x32xf32> to vector<1x1x32xf32>
    %c0_217 = arith.constant 0 : index
    %567 = arith.index_cast %490 : i32 to index
    %c0_218 = arith.constant 0 : index
    %568 = vector.load %arg12[%c0_217, %567, %c0_218] : memref<1x8x32xf32, #tpu.memory_space<vmem>>, vector<1x1x32xf32>
    tpu.vector_store %arg12[%c0_217, %567, %c0_218], %566 {strides = array<i32>} : memref<1x8x32xf32, #tpu.memory_space<vmem>>, vector<1x1x32xf32>,
    %c7_i32_219 = arith.constant 7 : i32
    %c7_i32_220 = arith.constant 7 : i32
    %569 = arith.subi %c7_i32_220, %c7_i32_219 : i32
    %c0_221 = arith.constant 0 : index
    %570 = arith.index_cast %c7_i32_219 : i32 to index
    %c0_222 = arith.constant 0 : index
    %571 = vector.load %arg9[%c0_221, %570, %c0_222] : memref<1x8x128xf32, #tpu.memory_space<vmem>>, vector<1x1x128xf32>
    %572 = vector.shape_cast %571 : vector<1x1x128xf32> to vector<1x128xf32>
    %cst_223 = arith.constant dense<0.000000e+00> : vector<1x128xf32>
    %573 = tpu.matmul %531, %13, %cst_223 {dimension_numbers = #tpu.dot_dimension_numbers<[1], [0], [0], [1], [0, 0, 1, 1], [], []>} : vector<1x32xf32>, vector<32x128xf32>, vector<1x128xf32> -> vector<1x128xf32>
    %574 = arith.addf %572, %573 : vector<1x128xf32>
    %c0_224 = arith.constant 0 : index
    %575 = arith.index_cast %569 : i32 to index
    %c0_225 = arith.constant 0 : index
    %576 = vector.load %arg10[%c0_224, %575, %c0_225] : memref<1x8x128xf32, #tpu.memory_space<vmem>>, vector<1x1x128xf32>
    %577 = vector.shape_cast %576 : vector<1x1x128xf32> to vector<1x128xf32>
    %cst_226 = arith.constant dense<0.000000e+00> : vector<1x128xf32>
    %578 = tpu.matmul %562, %14, %cst_226 {dimension_numbers = #tpu.dot_dimension_numbers<[1], [0], [0], [1], [0, 0, 1, 1], [], []>} : vector<1x32xf32>, vector<32x128xf32>, vector<1x128xf32> -> vector<1x128xf32>
    %579 = arith.addf %577, %578 : vector<1x128xf32>
    %580 = vector.extract_strided_slice %574 {offsets = [0, 0], sizes = [1, 32], strides = [1, 1]} : vector<1x128xf32> to vector<1x32xf32>
    %cst_227 = arith.constant 0.000000e+00 : f32
    %581 = vector.broadcast %cst_227 : f32 to vector<1x32xf32>
    %582 = arith.subf %581, %580 : vector<1x32xf32>
    %583 = math.exp %582 : vector<1x32xf32>
    %cst_228 = arith.constant 1.000000e+00 : f32
    %584 = vector.broadcast %cst_228 : f32 to vector<1x32xf32>
    %585 = arith.addf %584, %583 : vector<1x32xf32>
    %cst_229 = arith.constant 1.000000e+00 : f32
    %586 = vector.broadcast %cst_229 : f32 to vector<1x32xf32>
    %587 = arith.divf %586, %585 : vector<1x32xf32>
    %588 = vector.extract_strided_slice %574 {offsets = [0, 32], sizes = [1, 32], strides = [1, 1]} : vector<1x128xf32> to vector<1x32xf32>
    %cst_230 = arith.constant 0.000000e+00 : f32
    %589 = vector.broadcast %cst_230 : f32 to vector<1x32xf32>
    %590 = arith.subf %589, %588 : vector<1x32xf32>
    %591 = math.exp %590 : vector<1x32xf32>
    %cst_231 = arith.constant 1.000000e+00 : f32
    %592 = vector.broadcast %cst_231 : f32 to vector<1x32xf32>
    %593 = arith.addf %592, %591 : vector<1x32xf32>
    %cst_232 = arith.constant 1.000000e+00 : f32
    %594 = vector.broadcast %cst_232 : f32 to vector<1x32xf32>
    %595 = arith.divf %594, %593 : vector<1x32xf32>
    %596 = vector.extract_strided_slice %574 {offsets = [0, 64], sizes = [1, 32], strides = [1, 1]} : vector<1x128xf32> to vector<1x32xf32>
    %597 = math.tanh %596 : vector<1x32xf32>
    %598 = vector.extract_strided_slice %574 {offsets = [0, 96], sizes = [1, 32], strides = [1, 1]} : vector<1x128xf32> to vector<1x32xf32>
    %cst_233 = arith.constant 0.000000e+00 : f32
    %599 = vector.broadcast %cst_233 : f32 to vector<1x32xf32>
    %600 = arith.subf %599, %598 : vector<1x32xf32>
    %601 = math.exp %600 : vector<1x32xf32>
    %cst_234 = arith.constant 1.000000e+00 : f32
    %602 = vector.broadcast %cst_234 : f32 to vector<1x32xf32>
    %603 = arith.addf %602, %601 : vector<1x32xf32>
    %cst_235 = arith.constant 1.000000e+00 : f32
    %604 = vector.broadcast %cst_235 : f32 to vector<1x32xf32>
    %605 = arith.divf %604, %603 : vector<1x32xf32>
    %606 = arith.mulf %595, %529 : vector<1x32xf32>
    %607 = arith.mulf %587, %597 : vector<1x32xf32>
    %608 = arith.addf %606, %607 : vector<1x32xf32>
    %609 = math.tanh %608 : vector<1x32xf32>
    %610 = arith.mulf %605, %609 : vector<1x32xf32>
    %611 = vector.extract_strided_slice %579 {offsets = [0, 0], sizes = [1, 32], strides = [1, 1]} : vector<1x128xf32> to vector<1x32xf32>
    %cst_236 = arith.constant 0.000000e+00 : f32
    %612 = vector.broadcast %cst_236 : f32 to vector<1x32xf32>
    %613 = arith.subf %612, %611 : vector<1x32xf32>
    %614 = math.exp %613 : vector<1x32xf32>
    %cst_237 = arith.constant 1.000000e+00 : f32
    %615 = vector.broadcast %cst_237 : f32 to vector<1x32xf32>
    %616 = arith.addf %615, %614 : vector<1x32xf32>
    %cst_238 = arith.constant 1.000000e+00 : f32
    %617 = vector.broadcast %cst_238 : f32 to vector<1x32xf32>
    %618 = arith.divf %617, %616 : vector<1x32xf32>
    %619 = vector.extract_strided_slice %579 {offsets = [0, 32], sizes = [1, 32], strides = [1, 1]} : vector<1x128xf32> to vector<1x32xf32>
    %cst_239 = arith.constant 0.000000e+00 : f32
    %620 = vector.broadcast %cst_239 : f32 to vector<1x32xf32>
    %621 = arith.subf %620, %619 : vector<1x32xf32>
    %622 = math.exp %621 : vector<1x32xf32>
    %cst_240 = arith.constant 1.000000e+00 : f32
    %623 = vector.broadcast %cst_240 : f32 to vector<1x32xf32>
    %624 = arith.addf %623, %622 : vector<1x32xf32>
    %cst_241 = arith.constant 1.000000e+00 : f32
    %625 = vector.broadcast %cst_241 : f32 to vector<1x32xf32>
    %626 = arith.divf %625, %624 : vector<1x32xf32>
    %627 = vector.extract_strided_slice %579 {offsets = [0, 64], sizes = [1, 32], strides = [1, 1]} : vector<1x128xf32> to vector<1x32xf32>
    %628 = math.tanh %627 : vector<1x32xf32>
    %629 = vector.extract_strided_slice %579 {offsets = [0, 96], sizes = [1, 32], strides = [1, 1]} : vector<1x128xf32> to vector<1x32xf32>
    %cst_242 = arith.constant 0.000000e+00 : f32
    %630 = vector.broadcast %cst_242 : f32 to vector<1x32xf32>
    %631 = arith.subf %630, %629 : vector<1x32xf32>
    %632 = math.exp %631 : vector<1x32xf32>
    %cst_243 = arith.constant 1.000000e+00 : f32
    %633 = vector.broadcast %cst_243 : f32 to vector<1x32xf32>
    %634 = arith.addf %633, %632 : vector<1x32xf32>
    %cst_244 = arith.constant 1.000000e+00 : f32
    %635 = vector.broadcast %cst_244 : f32 to vector<1x32xf32>
    %636 = arith.divf %635, %634 : vector<1x32xf32>
    %637 = arith.mulf %626, %560 : vector<1x32xf32>
    %638 = arith.mulf %618, %628 : vector<1x32xf32>
    %639 = arith.addf %637, %638 : vector<1x32xf32>
    %640 = math.tanh %639 : vector<1x32xf32>
    %641 = arith.mulf %636, %640 : vector<1x32xf32>
    %642 = vector.shape_cast %610 : vector<1x32xf32> to vector<1x1x32xf32>
    %c0_245 = arith.constant 0 : index
    %643 = arith.index_cast %c7_i32_219 : i32 to index
    %c0_246 = arith.constant 0 : index
    %644 = vector.load %arg11[%c0_245, %643, %c0_246] : memref<1x8x32xf32, #tpu.memory_space<vmem>>, vector<1x1x32xf32>
    tpu.vector_store %arg11[%c0_245, %643, %c0_246], %642 {strides = array<i32>} : memref<1x8x32xf32, #tpu.memory_space<vmem>>, vector<1x1x32xf32>,
    %645 = vector.shape_cast %641 : vector<1x32xf32> to vector<1x1x32xf32>
    %c0_247 = arith.constant 0 : index
    %646 = arith.index_cast %569 : i32 to index
    %c0_248 = arith.constant 0 : index
    %647 = vector.load %arg12[%c0_247, %646, %c0_248] : memref<1x8x32xf32, #tpu.memory_space<vmem>>, vector<1x1x32xf32>
    tpu.vector_store %arg12[%c0_247, %646, %c0_248], %645 {strides = array<i32>} : memref<1x8x32xf32, #tpu.memory_space<vmem>>, vector<1x1x32xf32>,
    %c8_i32 = arith.constant 8 : i32
    %c0_249 = arith.constant 0 : index
    %c0_250 = arith.constant 0 : index
    %c0_251 = arith.constant 0 : index
    %648 = vector.load %arg11[%c0_249, %c0_250, %c0_251] : memref<1x8x32xf32, #tpu.memory_space<vmem>>, vector<1x8x32xf32>
    %649 = vector.shape_cast %648 : vector<1x8x32xf32> to vector<8x32xf32>
    %c0_252 = arith.constant 0 : index
    %c0_253 = arith.constant 0 : index
    %c0_254 = arith.constant 0 : index
    %650 = vector.load %arg12[%c0_252, %c0_253, %c0_254] : memref<1x8x32xf32, #tpu.memory_space<vmem>>, vector<1x8x32xf32>
    %651 = vector.shape_cast %650 : vector<1x8x32xf32> to vector<8x32xf32>
    %652 = tpu.concatenate %649, %651 in 1 : vector<8x32xf32>, vector<8x32xf32> -> vector<8x64xf32>
    %c0_255 = arith.constant 0 : index
    %c0_256 = arith.constant 0 : index
    %653 = vector.load %arg6[%c0_255, %c0_256] : memref<64x128xf32, #tpu.memory_space<vmem>>, vector<64x128xf32>
    %cst_257 = arith.constant dense<0.000000e+00> : vector<8x128xf32>
    %654 = tpu.matmul %652, %653, %cst_257 {dimension_numbers = #tpu.dot_dimension_numbers<[1], [0], [0], [1], [0, 0, 1, 1], [], []>} : vector<8x64xf32>, vector<64x128xf32>, vector<8x128xf32> -> vector<8x128xf32>
    %c0_258 = arith.constant 0 : index
    %c0_259 = arith.constant 0 : index
    %655 = vector.load %arg7[%c0_258, %c0_259] : memref<1x128xf32, #tpu.memory_space<vmem>>, vector<1x128xf32>
    %656 = vector.broadcast %655 : vector<1x128xf32> to vector<8x128xf32>
    %657 = arith.addf %654, %656 : vector<8x128xf32>
    %658 = vector.shape_cast %657 : vector<8x128xf32> to vector<1x8x128xf32>
    %c0_260 = arith.constant 0 : index
    %c0_261 = arith.constant 0 : index
    %c0_262 = arith.constant 0 : index
    %659 = vector.load %arg8[%c0_260, %c0_261, %c0_262] : memref<1x8x128xf32, #tpu.memory_space<vmem>>, vector<1x8x128xf32>
    tpu.vector_store %arg8[%c0_260, %c0_261, %c0_262], %658 {strides = array<i32>} : memref<1x8x128xf32, #tpu.memory_space<vmem>>, vector<1x8x128xf32>,
    return
  }
  func.func @transform_0(%arg0: i32) -> (i32, i32, i32) {
    %c0_i32 = arith.constant 0 : i32
    %c0_i32_0 = arith.constant 0 : i32
    %c0_i32_1 = arith.constant 0 : i32
    return %arg0, %c0_i32, %c0_i32_0 : i32, i32, i32
  }
  func.func @transform_1(%arg0: i32) -> (i32, i32) {
    %c0_i32 = arith.constant 0 : i32
    %c0_i32_0 = arith.constant 0 : i32
    %c0_i32_1 = arith.constant 0 : i32
    return %c0_i32, %c0_i32_0 : i32, i32
  }
  func.func @transform_2(%arg0: i32) -> (i32, i32) {
    %c0_i32 = arith.constant 0 : i32
    %c0_i32_0 = arith.constant 0 : i32
    %c0_i32_1 = arith.constant 0 : i32
    return %c0_i32, %c0_i32_0 : i32, i32
  }
  func.func @transform_3(%arg0: i32) -> (i32, i32) {
    %c0_i32 = arith.constant 0 : i32
    %c0_i32_0 = arith.constant 0 : i32
    %c0_i32_1 = arith.constant 0 : i32
    return %c0_i32, %c0_i32_0 : i32, i32
  }
  func.func @transform_4(%arg0: i32) -> (i32, i32) {
    %c0_i32 = arith.constant 0 : i32
    %c0_i32_0 = arith.constant 0 : i32
    %c0_i32_1 = arith.constant 0 : i32
    return %c0_i32, %c0_i32_0 : i32, i32
  }
  func.func @transform_5(%arg0: i32) -> (i32, i32) {
    %c0_i32 = arith.constant 0 : i32
    %c0_i32_0 = arith.constant 0 : i32
    %c0_i32_1 = arith.constant 0 : i32
    return %c0_i32, %c0_i32_0 : i32, i32
  }
  func.func @transform_6(%arg0: i32) -> (i32, i32) {
    %c0_i32 = arith.constant 0 : i32
    %c0_i32_0 = arith.constant 0 : i32
    %c0_i32_1 = arith.constant 0 : i32
    return %c0_i32, %c0_i32_0 : i32, i32
  }
  func.func @transform_7(%arg0: i32) -> (i32, i32, i32) {
    %c0_i32 = arith.constant 0 : i32
    %c0_i32_0 = arith.constant 0 : i32
    %c0_i32_1 = arith.constant 0 : i32
    return %arg0, %c0_i32, %c0_i32_0 : i32, i32, i32
  }
}

</mosaic_0001>

<bundles_post_ra>
// kernel: blstm_forward.1
= control target key start
LH: loop header
LB: loop body
LE: loop exit
PB: predicated region body
PF: predicated region fallthrough
CT: control target
= control target key end

     0   :  { %s3693_s0 = inlined_call_operand.hbm [shape: f32[2,8,80], index: 0, kind: input, shape index: {}]   ;;  %s3694_s1 = inlined_call_operand.hbm [shape: f32[80,256], index: 1, kind: input, shape index: {}]   ;;  %s3695_s2 = inlined_call_operand.vmem [shape: f32[1,256], index: 2, kind: input, shape index: {}]   ;;  %s3696_s3 = inlined_call_operand.hbm [shape: f32[32,128], index: 3, kind: input, shape index: {}]   ;;  %s3697_s4 = inlined_call_operand.hbm [shape: f32[32,128], index: 4, kind: input, shape index: {}]   ;;  %s3698_s5 = inlined_call_operand.hbm [shape: f32[64,128], index: 5, kind: input, shape index: {}]   ;;  %s3699_s6 = inlined_call_operand.vmem [shape: f32[1,128], index: 6, kind: input, shape index: {}]   ;;  %s3700_s7 = inlined_call_operand.hbm [shape: f32[2,8,128], index: 7, kind: output, shape index: {}]  }
   0x1   :  { %3705 = sst [smem:[#allocation20_spill]] %s3694_s1 }
   0x2   :  { %3706 = sst [smem:[#allocation21_spill]] %s3696_s3 }
   0x3   :  { %12 = vsyncpa [#allocation7], 0 }
   0x4   :  { %14 = vsyncpa [#allocation7 + $0x1], 0 }
   0x5   :  { %15 = vsyncpa [#allocation10], 0 }
   0x6   :  { %16 = vsyncpa [#allocation13], 0 }
   0x7   :  { %17 = vsyncpa [#allocation8], 0 }
   0x8   :  { %19 = vsyncpa [#allocation8 + $0x1], 0  ;;  %s3146_s24 = smov 0   ;;  %s3148_s25 = smov 0  }
   0x9   :  { %s3150_s26 = smov 0   ;;  %s3152_s27 = smov 0  }
   0xa LB: > { %s3092_s28 = smov [#allocation9]   ;;  %s3167_s30 = sadd.s32 4294967295, %s3090_s27   ;;  %s3090_s27 = sphi %s3152_s27, %s3728_s27   ;;  %s3086_s26 = sphi %s3150_s26, %s3727_s26   ;;  %s3082_s25 = sphi %s3148_s25, %s3726_s25   ;;  %s3078_s24 = sphi %s3146_s24, %s3725_s24  }
   0xb   : > { %s220_s29 = sshll.u32 %s3092_s28, 4  ;;  %p2339_p0 = scmp.ge.s32.totalorder %s3090_s27, 1  ;;  %s221_s29 = int_to_ptr.vmem [resolvable:$true] %s220_s29 }
   0xc   : > { %p3701_p1 = scmp.eq.s32.totalorder %s3167_s30, 0  ;;  %p208_p2 = scmp.lt.s32.totalorder %s3090_s27, 3 }
   0xd   : > { %s3093_s10 = smov [#allocation12]   ;;  %s3094_s12 = smov [#allocation11]  }
   0xe   : > { %p3172_p3 = pnand %p2339_p0, %p208_p2  ;;  %s249_s11 = sshll.u32 %s3093_s10, 4  ;;  %s3185_s11 = int_to_ptr.vmem [resolvable:$true] %s249_s11 }
   0xf   : > { %s3187_s13 = sshll.u32 %s3094_s12, 4  ;;  %s2897_s14 = scalar_lea.vmem %s221_s29, 2560  ;;  %s237_s13 = int_to_ptr.vmem [resolvable:$true] %s3187_s13 }
  0x10   : > { %s3707_s8 = scalar_select %p3172_p3, 1, 0 }
  0x11   : > { %p2679_p5 = pneg %p3172_p3  ;;  %p2898_p8 = scmp.ne.s32.totalorder %s221_s29, %s2897_s14 }
  0x12   : > { %p2905_p11 = scmp.lt.s32.totalorder %s221_s29, %s221_s29  ;;  %p2906_p12 = scmp.lt.s32.totalorder %s2897_s14, %s2897_s14 }
  0x13   : > { %p3181_p6 = pnand %p2679_p5, %p3701_p1 }
  0x14   : > { %p2907_p13 = por %p2906_p12, %p2905_p11 }
  0x15   : > { %p2888_p7 = pneg %p3181_p6 }
  0x17   : > { %p2900_p9 = pnand %p2898_p8, %p2888_p7 }
  0x19   : > { %p2901_p10 = pneg %p2900_p9 }
  0x1b   : > { %p2908_p0 = pnand %p2907_p13, %p2901_p10 }
  0x1d   : > { %2911 = shalt.err (!%p2908_p0)
}
  0x1e   : > { %s3095_s15 = smov 256   ;;  %s3096_s16 = smov 16  }
  0x1f   : > { %s3709_s1 = sld [smem:[#allocation20_spill]]  ;;  %s2923_s19 = scalar_lea.vmem %s3185_s11, 512 }
  0x20   : > { %p2924_p2 = scmp.ne.s32.totalorder %s3185_s11, %s2923_s19  ;;  %p2931_p9 = scmp.lt.s32.totalorder %s3185_s11, %s3185_s11 }
  0x21   : > { %p2932_p10 = scmp.lt.s32.totalorder %s2923_s19, %s2923_s19 }
  0x22   : > { %p2926_p5 = pnand %p2924_p2, %p2888_p7 }
  0x23   : > { %p2933_p11 = por %p2932_p10, %p2931_p9 }
  0x24   : > { %p2927_p8 = pneg %p2926_p5 }
  0x25   : > { %2682 = dma.hbm_to_vmem [thread:$0]  (!%p3181_p6), %s3709_s1, 2560, %s221_s29, [#allocation10], %s3095_s15, %s3095_s15, %s3096_s16  }
  0x26   : > { %p2934_p12 = pnand %p2933_p11, %p2927_p8 }
  0x28   : > { %2937 = shalt.err (!%p2934_p12)
}
  0x29   : > { %s3097_s20 = smov 128   ;;  %s3098_s21 = smov 8  }
  0x2a   : > { %2688 = dma.hbm_to_vmem [thread:$0]  (!%p3181_p6), %s3697_s4, 512, %s3185_s11, [#allocation13], %s3097_s20, %s3097_s20, %s3098_s21  }
  0x2b   : > { %s2949_s28 = scalar_lea.vmem %s237_s13, 512  ;;  %p2957_p5 = scmp.lt.s32.totalorder %s237_s13, %s237_s13 }
  0x2c   : > { %p2950_p13 = scmp.ne.s32.totalorder %s237_s13, %s2949_s28  ;;  %p2958_p8 = scmp.lt.s32.totalorder %s2949_s28, %s2949_s28 }
  0x2e   : > { %p2952_p0 = pnand %p2950_p13, %p2888_p7  ;;  %p2959_p9 = por %p2958_p8, %p2957_p5 }
  0x30   : > { %p2953_p2 = pneg %p2952_p0 }
  0x32   : > { %p2960_p10 = pnand %p2959_p9, %p2953_p2 }
  0x34   : > { %2963 = shalt.err (!%p2960_p10)
}
  0x35   : > { %s3710_s3 = sld [smem:[#allocation21_spill]]  ;;  %s3099_s11 = smov [#allocation14]  }
  0x36   : > { %s262_s12 = sshll.u32 %s3099_s11, 4  ;;  %s263_s12 = int_to_ptr.vmem [resolvable:$true] %s262_s12 }
  0x37   : > { %s2975_s14 = scalar_lea.vmem %s263_s12, 1024  ;;  %p2983_p0 = scmp.lt.s32.totalorder %s263_s12, %s263_s12 }
  0x38   : > { %p2976_p11 = scmp.ne.s32.totalorder %s263_s12, %s2975_s14  ;;  %p2984_p5 = scmp.lt.s32.totalorder %s2975_s14, %s2975_s14 }
  0x3a   : > { %p2978_p12 = pnand %p2976_p11, %p2888_p7  ;;  %p2985_p2 = por %p2984_p5, %p2983_p0 }
  0x3b   : > { %2685 = dma.hbm_to_vmem [thread:$0]  (!%p3181_p6), %s3710_s3, 512, %s237_s13, [#allocation10], %s3097_s20, %s3097_s20, %s3098_s21  }
  0x3c   : > { %p2979_p13 = pneg %p2978_p12 }
  0x3e   : > { %p2986_p8 = pnand %p2985_p2, %p2979_p13 }
  0x40   : > { %2989 = shalt.err (!%p2986_p8)
}
  0x41   : > { %2691 = dma.hbm_to_vmem [thread:$0]  (!%p3181_p6), %s3698_s5, 1024, %s263_s12, [#allocation13], %s3097_s20, %s3097_s20, %s3098_s21  }
  0x42   : > { %s2338_s13 = sadd.s32 4294967294, %s3090_s27   ;;  %s3231_s9 = sadd.s32 1, %s3090_s27  }
  0x43   : > { %s29_s17 = ssub.s32 %s3090_s27, %s3231_s9  ;;  %s32_s18 = sadd.s32 1, %s3086_s26 }
  0x44   : > { %p30_p7 = scmp.eq.s32.totalorder %s29_s17, 0  ;;  %p39_p9 = scmp.ne.s32.totalorder %s3086_s26, %s3082_s25 }
  0x45   : > { %p40_p10 = scmp.eq.s32.totalorder %s3090_s27, 0  ;;  %p45_p11 = scmp.ne.s32.totalorder %s3082_s25, %s3078_s24 }
  0x46   : > { %s3242_s19 = scalar_select %p30_p7, %s3086_s26, %s32_s18  }
  0x47   : > { %p3244_p12 = por %p40_p10, %p39_p9  ;;  %p3250_p6 = por %p3701_p1, %p45_p11 }
  0x48   : > { %p195_p13 = scmp.eq.s32.totalorder %s3167_s30, 1  ;;  %p201_p0 = scmp.eq.s32.totalorder %s2338_s13, 1 }
  0x49   : > { %s3712_s20 = scalar_select %p3250_p6, 1, 0 }
  0x4a   : > { %p2704_p5 = scmp.lt.s32.totalorder %s3090_s27, 2  ;;  %s279_s21 = sand.u32 1, %s3086_s26  }
  0x4b   : > { %p3257_p2 = por %p195_p13, %p39_p9  ;;  %p3261_p8 = por %p201_p0, %p45_p11 }
  0x4c   : > { %s2345_s29 = sshll.u32 %s279_s21, 3  ;;  %s2346_s10 = sshll.u32 %s3090_s27, 7 }
  0x4d   : > { %s3713_s23 = scalar_select %p3257_p2, 1, 0 }
  0x4e   : > { %s3714_s28 = scalar_select %p3261_p8, 1, 0 }
  0x4f   : > { %s3269_s14 = scalar_lea.hbm %s3693_s0, %s2346_s10  ;;  %s283_s15 = scalar_lea.vmem [#allocation6], %s2345_s29 }
  0x50   : > { %s290_s16 = sshll.u32 %s283_s15, 4  ;;  %p3273_p7 = pnand %p2704_p5, %p3244_p12  ;;  %s291_s16 = int_to_ptr.vmem [resolvable:$true] %s290_s16 }
  0x51   : > { %s280_s17 = scalar_lea.sflag [#allocation7], %s279_s21  ;;  %s2990_s18 = scalar_lea.hbm %s3269_s14, 128 }
  0x52   : > { %p2991_p9 = scmp.ne.s32.totalorder %s3269_s14, %s2990_s18  ;;  %p2992_p10 = pneg %p3273_p7 }
  0x53   : > { %s2995_s12 = scalar_lea.hbm %s3693_s0, 256  ;;  %p2996_p0 = scmp.lt.s32.totalorder %s3269_s14, %s3693_s0 }
  0x54   : > { %p2993_p11 = pnand %p2992_p10, %p2991_p9  ;;  %p2997_p12 = scmp.lt.s32.totalorder %s2995_s12, %s2990_s18 }
  0x56   : > { %p2994_p13 = pneg %p2993_p11  ;;  %p2998_p5 = por %p2997_p12, %p2996_p0 }
  0x58   : > { %p2999_p4 = pnand %p2998_p5, %p2994_p13 }
  0x5a   : > { %3002 = shalt.err (!%p2999_p4)
}
  0x5b   : > { %s3003_s22 = scalar_lea.vmem %s291_s16, 128  ;;  %s3100_s21 = smov [#allocation6]  }
  0x5c   : > { %p3004_p1 = scmp.ne.s32.totalorder %s291_s16, %s3003_s22  ;;  %s3008_s1 = sshll.u32 %s3100_s21, 4  ;;  %s3009_s1 = int_to_ptr.vmem [resolvable:$false] %s3008_s1 }
  0x5d   : > { %s3010_s3 = scalar_lea.vmem %s3009_s1, 256  ;;  %p3011_p9 = scmp.lt.s32.totalorder %s291_s16, %s3009_s1 }
  0x5e   : > { %p3006_p8 = pnand %p3004_p1, %p2992_p10  ;;  %p3012_p11 = scmp.lt.s32.totalorder %s3010_s3, %s3003_s22 }
  0x60   : > { %p3007_p2 = pneg %p3006_p8  ;;  %p3013_p6 = por %p3012_p11, %p3011_p9 }
  0x62   : > { %p3014_p3 = pnand %p3013_p6, %p3007_p2 }
  0x64   : > { %3017 = shalt.err (!%p3014_p3)
}
  0x65   : > { %2695 = dma.hbm_to_vmem [thread:$0]  (!%p3273_p7), %s3269_s14, 128, %s291_s16, %s280_s17  }
  0x66   : > { %p3716_p13 = scmp.ne.s32.totalorder %s3707_s8, 0 }
  0x67   : > { %s3294_s18 = sand.u32 (!%p3716_p13), 1, %s3082_s25   ;;  %p3717_p1 = scmp.ne.s32.totalorder (!%p3716_p13), %s3712_s20, 0 }
  0x68   : > { %299 = sbr.rel (%p3716_p13) target bundleno = 5994 (0x176a), region = 48  ;;  %s2348_s10 = sshll.u32 (!%p3716_p13), %s3294_s18, 3 }
  0x69   : > { %s302_s1 = scalar_lea.sflag (!%p3716_p13), [#allocation7], %s3294_s18  ;;  %s3300_s3 = scalar_lea.vmem (!%p3716_p13), [#allocation6], %s2348_s10 }
  0x6d   : > { %3061 = dma.done.wait (%p3717_p1), %s302_s1, 128  }
  0x6e   : > { %3063 = vsyncadd (%p3717_p1), %s302_s1, 4294967168  ;;  %p3718_p3 = scmp.eq.s32.totalorder %s3167_s30, 0 }
  0x70   : > { %3065 = dma.done.wait (%p3718_p3), [#allocation10], 3072   ;;  %p3719_p4 = pmov %p3718_p3 }
  0x71   : > { %p3720_p6 = pmov %p3718_p3 }
  0x72   : > { %3067 = vsyncadd (%p3719_p4), [#allocation10], 4294964224 }
  0x73   : > { %3069 = dma.done.wait (%p3720_p6), [#allocation13], 1536   ;;  %p3721_p2 = pmov %p3718_p3 }
  0x74   : > { %v3101_v0 = vmov 0.0   ;;  %vm3102_vm0 = vmmov 0   ;;  %v372_v1 = vld [vmem:[#allocation9 + $0x98] sm:$0xff]  ;;  %v371_v2 = vld [vmem:[#allocation9 + $0x90] sm:$0xff]  ;;  %v370_v3 = vld [vmem:[#allocation9 + $0x88] sm:$0xff]  ;;  %vm385_vm1 = vcmask 654336   ;;  %v375_v30 = vlaneseq }
  0x75   : > { %3071 = vsyncadd (%p3721_p2), [#allocation13], 4294965760  ;;  %453 = vmatprep.mubr.f32.mxu0 %v3101_v0  ;;  %2475 = vmatprep.subr.mxu1 %v3101_v0  ;;  %v369_v4 = vld [vmem:[#allocation9 + $0x80] sm:$0xff]  ;;  %v368_v5 = vld [vmem:[#allocation9 + $0x78] sm:$0xff]  ;;  %s3103_s14 = smov 64   ;;  %s3104_s16 = smov 32  }
  0x76   : > { %2483 = vmatprep.mubr.msk.f32.mxu1 %vm3102_vm0, %v3101_v0  ;;  %401 = vmatprep.subr.mxu0 %v372_v1  ;;  %v367_v6 = vld [vmem:[#allocation9 + $0x70] sm:$0xff]  ;;  %v366_v7 = vld [vmem:[#allocation9 + $0x68] sm:$0xff]  ;;  %v365_v8 = vld [vmem:[#allocation9 + $0x60] sm:$0xff]  ;;  %v376_v31 = vshrl.u32 %v375_v30, 7  ;;  %vm670_vm2 = vcmask 253952   ;;  %vm471_vm3 = vcmask 261120  }
  0x77   : > { %402 = vmatpush1.msra.mxu0 %v371_v2  ;;  %v364_v9 = vld [vmem:[#allocation9 + $0x58] sm:$0xff]  ;;  %v363_v10 = vld [vmem:[#allocation9 + $0x50] sm:$0xff]  ;;  %v362_v12 = vld [vmem:[#allocation9 + $0x48] sm:$0xff]  ;;  %vm2141_vm4 = vcmask 523264   ;;  %s2372_s11 = sshll.u32 %s3167_s30, 7  ;;  %s351_s12 = scalar_lea.vmem [#allocation15], %s2348_s10 }
  0x78   : > { %403 = vmatprep.subr.mxu0 %v370_v3  ;;  %v3318_v11 = vld [vmem:[#allocation12 + $0x18] sm:$0xff]  ;;  %v3321_v13 = vld [vmem:[#allocation12 + $0x10] sm:$0xff]  ;;  %v361_v14 = vld [vmem:[#allocation9 + $0x40] sm:$0xff]  ;;  %v377_v32 = vsub.s32 0, %v376_v31  ;;  %v381_v35 = vsub.s32 1, %v376_v31  ;;  %s2230_s29 = sshll.u32 %s351_s12, 4  ;;  %s3656_s21 = scalar_lea.hbm %s3700_s7, %s2372_s11  ;;  %s2231_s29 = int_to_ptr.vmem [resolvable:$true] %s2230_s29 }
  0x79   : > { %404 = vmatpush1.msra.mxu0 %v369_v4  ;;  %2476 = vmatpush3.msra.mxu1 %v3318_v11  ;;  %v3324_v15 = vld [vmem:[#allocation12 + $0x8] sm:$0xff]  ;;  %v360_v16 = vld [vmem:[#allocation9 + $0x38] sm:$0xff]  ;;  %v359_v17 = vld [vmem:[#allocation9 + $0x30] sm:$0xff]  ;;  %s2217_s1 = scalar_lea.sflag [#allocation8], %s3294_s18  ;;  %p3722_p7 = scmp.ne.s32.totalorder %s3713_s23, 0 }
  0x7a   : > { %405 = vmatprep.subr.mxu0 %v368_v5  ;;  %2477 = vmatprep.subr.mxu1 %v3101_v0  ;;  %v3328_v18 = vld [vmem:[#allocation12] sm:$0xff]  ;;  %v358_v19 = vld [vmem:[#allocation9 + $0x28] sm:$0xff]  ;;  %v356_v21 = vld [vmem:[#allocation9 + $0x18] sm:$0xff]  ;;  %s3105_s30 = smov [#allocation15]  }
  0x7b   : > { %406 = vmatpush1.msra.mxu0 %v367_v6  ;;  %2478 = vmatpush3.msra.mxu1 %v3321_v13  ;;  %v357_v20 = vld [vmem:[#allocation9 + $0x20] sm:$0xff]  ;;  %v355_v22 = vld [vmem:[#allocation9 + $0x10] sm:$0xff]  ;;  %v354_v23 = vld [vmem:[#allocation9 + $0x8] sm:$0xff]  ;;  %s3022_s8 = sshll.u32 %s3105_s30, 4  ;;  %s3023_s8 = int_to_ptr.vmem [resolvable:$false] %s3022_s8 }
  0x7c   : > { %407 = vmatprep.subr.mxu0 %v366_v7  ;;  %2479 = vmatprep.subr.mxu1 %v3101_v0  ;;  %v3334_v24 = vld [vmem:[#allocation11 + $0x18] sm:$0xff]  ;;  %v353_v25 = vld [vmem:[#allocation9] sm:$0xff]  ;;  %v3339_v27 = vld [vmem:[#allocation11 + $0x10] sm:$0xff]  ;;  %s3024_s10 = scalar_lea.vmem %s3023_s8, 256  ;;  %p3025_p12 = scmp.lt.s32.totalorder %s2231_s29, %s3023_s8 }
  0x7d   : > { %408 = vmatpush1.msra.mxu0 %v365_v8  ;;  %2480 = vmatpush3.msra.mxu1 %v3324_v15  ;;  %v352_v26 = vld [vmem:[%s3300_s3] sm:$0xff]  ;;  %v3346_v28 = vld [vmem:[#allocation11 + $0x8] sm:$0xff]  ;;  %v3353_v29 = vld [vmem:[#allocation11] sm:$0xff]  ;;  %s3018_s3 = scalar_lea.vmem %s2231_s29, 128 }
  0x7e   : > { %409 = vmatprep.subr.mxu0 %v364_v9  ;;  %2481 = vmatprep.subr.mxu1 %v3101_v0  ;;  %v373_v33 = vld [vmem:[%s3695_s2] sm:$0x3]  ;;  %p3019_p8 = scmp.ne.s32.totalorder %s2231_s29, %s3018_s3  ;;  %p3026_p5 = scmp.lt.s32.totalorder %s3024_s10, %s3018_s3 }
  0x7f   : > { %410 = vmatpush1.msra.mxu0 %v363_v10  ;;  %2482 = vmatpush3.msra.mxu1 %v3328_v18  ;;  %v378_v37 = vrot.slane %v373_v33, %v377_v32  ;;  %v382_v38 = vrot.slane %v373_v33, %v381_v35 }
  0x80   : > { %411 = vmatprep.subr.mxu0 %v362_v12  ;;  %2484 = vmatmul.mubr.f32.vlgmr.msra.gmra.mxu1 %v3101_v0  ;;  %p3020_p10 = pnand %p3019_p8, %p3722_p7  ;;  %p3027_p9 = por %p3026_p5, %p3025_p12 }
  0x81   : > { %412 = vmatpush1.msra.mxu0 %v361_v14  ;;  %2486 = vmatprep.subr.mxu1 %v3101_v0 }
  0x82   : > { %413 = vmatprep.subr.mxu0 %v360_v16  ;;  %2487 = vmatpush3.msra.mxu1 %v3334_v24  ;;  %p3021_p0 = pneg %p3020_p10 }
  0x83   : > { %414 = vmatpush1.msra.mxu0 %v359_v17  ;;  %2488 = vmatprep.subr.mxu1 %v3101_v0 }
  0x84   : > { %415 = vmatprep.subr.mxu0 %v358_v19  ;;  %2489 = vmatpush3.msra.mxu1 %v3339_v27  ;;  %p3028_p11 = pnand %p3027_p9, %p3021_p0 }
  0x85   : > { %416 = vmatpush1.msra.mxu0 %v357_v20  ;;  %2490 = vmatprep.subr.mxu1 %v3101_v0 }
  0x86   : > { %417 = vmatprep.subr.mxu0 %v356_v21  ;;  %2491 = vmatpush3.msra.mxu1 %v3346_v28 }
  0x87   : > { %418 = vmatpush1.msra.mxu0 %v355_v22  ;;  %2492 = vmatprep.subr.mxu1 %v3101_v0 }
  0x88   : > { %419 = vmatprep.subr.mxu0 %v354_v23  ;;  %2493 = vmatpush3.msra.mxu1 %v3353_v29 }
  0x89   : > { %420 = vmatpush1.msra.mxu0 %v353_v25  ;;  %2494 = vmatprep.mubr.msk.f32.mxu1 %vm3102_vm0, %v3101_v0 }
  0x8a   : > { %2354 = vmatmul.mubr.msk.f32.vlgmr.msra.gmra.mxu0 %vm385_vm1, %v352_v26  ;;  %2464 = vmatprep.subr.mxu0 %v3101_v0 }
  0x8b   : > { %2465 = vmatpush3.msra.mxu0 %v3334_v24  ;;  %2472 = vmatprep.mubr.msk.f32.mxu0 %vm3102_vm0, %v3101_v0 }
  0x8c   : > { %2466 = vmatprep.subr.mxu0 %v3101_v0  ;;  %2508 = vmatprep.subr.mxu1 %v3101_v0 }
  0x8d   : > { %2467 = vmatpush3.msra.mxu0 %v3339_v27 }
  0x8e   : > { %2468 = vmatprep.subr.mxu0 %v3101_v0 }
  0x8f   : > { %2469 = vmatpush3.msra.mxu0 %v3346_v28 }
  0x90   : > { %2470 = vmatprep.subr.mxu0 %v3101_v0 }
  0x91   : > { %2471 = vmatpush3.msra.mxu0 %v3353_v29 }
  0x92   : > { %2473 = vmatmul.mubr.f32.vlgmr.msra.gmra.mxu0 %v3101_v0  ;;  %2497 = vmatprep.subr.mxu0 %v3101_v0 }
  0x93   : > { %2498 = vmatpush3.msra.mxu0 %v3318_v11  ;;  %2505 = vmatprep.mubr.msk.f32.mxu0 %vm3102_vm0, %v3101_v0 }
  0x94   : > { %2499 = vmatprep.subr.mxu0 %v3101_v0 }
  0x95   : > { %2500 = vmatpush3.msra.mxu0 %v3321_v13 }
  0x96   : > { %2501 = vmatprep.subr.mxu0 %v3101_v0 }
  0x97   : > { %2502 = vmatpush3.msra.mxu0 %v3324_v15 }
  0x98   : > { %2503 = vmatprep.subr.mxu0 %v3101_v0 }
  0x99   : > { %2504 = vmatpush3.msra.mxu0 %v3328_v18 }
  0x9a   : > { %2519 = vmatprep.subr.mxu0 %v3101_v0 }
 0x140   : > { %v613_v34 = vpop.f32.mrf.mxu1 }
 0x142   : > { %v2485_v36 = vpop.f32.mrf.mxu1 }
 0x14a   : > { %v455_v39 = vpop.f32.mrf.mxu0 }
 0x14b   : > { %v456_v40 = vadd.f32 %v455_v39, %v378_v37 }
 0x14c   : > { %v457_v41 = vpop.f32.mrf.mxu0 }
 0x14d   : > { %460 = vst [vmem:[#allocation2] sm:$0xff] %v456_v40  ;;  %v458_v42 = vadd.f32 %v457_v41, %v382_v38 }
 0x14f   : > { %461 = vst [vmem:[#allocation3] sm:$0xff] %v458_v42 }
 0x152   : > { %v541_v43 = vpop.f32.mrf.mxu0 }
 0x154   : > { %v2474_v44 = vpop.f32.mrf.mxu0  ;;  %v470_v45 = vld [vmem:[#allocation2] sm:$0x1]  ;;  %v677_v25 = vld [vmem:[#allocation2 + $0x1] sm:$0x1] }
 0x155   : > { %v545_v48 = vadd.f32 %v541_v43, %v470_v45 }
 0x156   : > { %v546_v46 = vld [vmem:[#allocation3 + $0x7] sm:$0x1]  ;;  %v751_v20 = vld [vmem:[#allocation3 + $0x6] sm:$0x1] }
 0x157   : > { %v617_v47 = vadd.f32 %v613_v34, %v546_v46  ;;  %v618_v52 = vsub.f32 0.0, %v545_v48 }
 0x159   : > { %2754 = vtanh.f32 %v617_v47  ;;  %v642_v51 = vsub.f32 0.0, %v617_v47  ;;  %v619_v54 = vmul.f32 1.442695, %v618_v52 }
 0x15a   : > { %2756 = vtanh.f32 %v545_v48 }
 0x15b   : > { %v643_v53 = vmul.f32 1.442695, %v642_v51 }
 0x15d   : > { %2758 = vpow2.f32 %v643_v53 }
 0x15e   : > { %2760 = vpow2.f32 %v619_v54 }
 0x166   : > { %v2755_v49 = vpop.eup %2754 }
 0x167   : > { %651 = vrot.lane.b32.xlu0 %v2755_v49, %s3103_s14  ;;  %v2757_v50 = vpop.eup %2756 }
 0x16a   : > { %v2759_v55 = vpop.eup %2758 }
 0x16b   : > { %627 = vrot.lane.b32.xlu0 %v2757_v50, %s3103_s14  ;;  %v645_v56 = vadd.f32 1.0, %v2759_v55  ;;  %v2761_v57 = vpop.eup %2760 }
 0x16c   : > { %v621_v58 = vadd.f32 1.0, %v2761_v57 }
 0x16d   : > { %2762 = vrcp.f32 %v645_v56 }
 0x16e   : > { %2764 = vrcp.f32 %v621_v58 }
 0x17a   : > { %v2763_v59 = vpop.eup %2762 }
 0x17b   : > { %v2765_v62 = vpop.eup %2764  ;;  %v649_v2 = vmul.f32 0.0, %v2763_v59 }
 0x17c   : > { %v625_v5 = vmul.f32 0.0, %v2765_v62 }
 0x1d9   : > { %v652_v60 = vpop.permute.xlu0 %651 }
 0x1da   : > { %v654_v61 = vmul.f32 %v2763_v59, %v652_v60 }
 0x1dc   : > { %656 = vrot.lane.b32.xlu1 %v654_v61, %s3104_s16 }
 0x1dd   : > { %v628_v63 = vpop.permute.xlu0 %627 }
 0x1de   : > { %v630_v1 = vmul.f32 %v2765_v62, %v628_v63 }
 0x1e0   : > { %632 = vrot.lane.b32.xlu1 %v630_v1, %s3104_s16 }
 0x24e   : > { %v657_v3 = vpop.permute.xlu1 %656 }
 0x24f   : > { %v3383_v4 = vadd.f32 %v657_v3, %v649_v2  ;;  %v883_v3 = vld [vmem:[#allocation2 + $0x2] sm:$0x1] }
 0x251   : > { %2766 = vtanh.f32 %v3383_v4 }
 0x252   : > { %v633_v6 = vpop.permute.xlu1 %632 }
 0x253   : > { %v3386_v7 = vadd.f32 %v633_v6, %v625_v5 }
 0x255   : > { %2768 = vtanh.f32 %v3386_v7 }
 0x25e   : > { %v2767_v8 = vpop.eup %2766 }
 0x25f   : > { %662 = vrot.lane.b32.xlu0 %v2767_v8, %s3103_s14 }
 0x262   : > { %v2769_v9 = vpop.eup %2768 }
 0x263   : > { %638 = vrot.lane.b32.xlu1 %v2769_v9, %s3103_s14 }
 0x2d1   : > { %v663_v10 = vpop.permute.xlu0 %662 }
 0x2d2   : > { %v665_v12 = vmul.f32 %v2763_v59, %v663_v10 }
 0x2d4   : > { %673 = vrot.lane.b32.xlu0 %v665_v12, %s3104_s16 }
 0x2d5   : > { %v639_v14 = vpop.permute.xlu1 %638 }
 0x2d6   : > { %v641_v16 = vmul.f32 %v2765_v62, %v639_v14  ;;  %v957_v62 = vld [vmem:[#allocation3 + $0x5] sm:$0x1] }
 0x2d8   : > { %667 = vrot.lane.b32.xlu1 %v641_v16, %s3104_s16 }
 0x346   : > { %v674_v17 = vpop.permute.xlu0 %673 }
 0x347   : > { %676 = vst.msk [vmem:[#allocation5 + $0x7] sm:$0x1] %vm670_vm2, %v674_v17  ;;  %2506 = vmatmul.mubr.msk.f32.vlgmr.msra.gmra.mxu0 %vm471_vm3, %v674_v17 }
 0x348   : > { %2520 = vmatpush3.msra.mxu0 %v3318_v11  ;;  %2527 = vmatprep.mubr.msk.f32.mxu0 %vm3102_vm0, %v3101_v0 }
 0x349   : > { %2521 = vmatprep.subr.mxu0 %v3101_v0 }
 0x34a   : > { %v668_v19 = vpop.permute.xlu1 %667  ;;  %2522 = vmatpush3.msra.mxu0 %v3321_v13 }
 0x34b   : > { %671 = vst.msk [vmem:[#allocation4] sm:$0x1] %vm670_vm2, %v668_v19  ;;  %2495 = vmatmul.mubr.msk.f32.vlgmr.msra.gmra.mxu1 %vm471_vm3, %v668_v19  ;;  %2523 = vmatprep.subr.mxu0 %v3101_v0 }
 0x34c   : > { %2509 = vmatpush3.msra.mxu1 %v3334_v24  ;;  %2524 = vmatpush3.msra.mxu0 %v3324_v15 }
 0x34d   : > { %2510 = vmatprep.subr.mxu1 %v3101_v0  ;;  %2525 = vmatprep.subr.mxu0 %v3101_v0 }
 0x34e   : > { %2526 = vmatpush3.msra.mxu0 %v3328_v18  ;;  %2511 = vmatpush3.msra.mxu1 %v3339_v27 }
 0x34f   : > { %2512 = vmatprep.subr.mxu1 %v3101_v0  ;;  %2516 = vmatprep.mubr.msk.f32.mxu1 %vm3102_vm0, %v3101_v0 }
 0x350   : > { %2513 = vmatpush3.msra.mxu1 %v3346_v28  ;;  %2541 = vmatprep.subr.mxu0 %v3101_v0 }
 0x351   : > { %2514 = vmatprep.subr.mxu1 %v3101_v0 }
 0x352   : > { %2515 = vmatpush3.msra.mxu1 %v3353_v29 }
 0x353   : > { %2530 = vmatprep.subr.mxu1 %v3101_v0 }
 0x407   : > { %v820_v21 = vpop.f32.mrf.mxu0 }
 0x408   : > { %v824_v22 = vadd.f32 %v820_v21, %v751_v20 }
 0x409   : > { %v2507_v23 = vpop.f32.mrf.mxu0 }
 0x40a   : > { %2770 = vtanh.f32 %v824_v22  ;;  %v849_v34 = vsub.f32 0.0, %v824_v22 }
 0x40b   : > { %v746_v26 = vpop.f32.mrf.mxu1 }
 0x40c   : > { %v750_v30 = vadd.f32 %v746_v26, %v677_v25  ;;  %v850_v35 = vmul.f32 1.442695, %v849_v34 }
 0x40d   : > { %v2496_v31 = vpop.f32.mrf.mxu1 }
 0x40e   : > { %2772 = vtanh.f32 %v750_v30  ;;  %v825_v36 = vsub.f32 0.0, %v750_v30 }
 0x40f   : > { %2774 = vpow2.f32 %v850_v35 }
 0x410   : > { %v826_v37 = vmul.f32 1.442695, %v825_v36 }
 0x412   : > { %2776 = vpow2.f32 %v826_v37 }
 0x417   : > { %v2771_v32 = vpop.eup %2770 }
 0x418   : > { %858 = vrot.lane.b32.xlu0 %v2771_v32, %s3103_s14 }
 0x41b   : > { %v2773_v33 = vpop.eup %2772 }
 0x41c   : > { %834 = vrot.lane.b32.xlu1 %v2773_v33, %s3103_s14  ;;  %v2775_v38 = vpop.eup %2774 }
 0x41d   : > { %v852_v39 = vadd.f32 1.0, %v2775_v38 }
 0x41f   : > { %v2777_v40 = vpop.eup %2776  ;;  %2778 = vrcp.f32 %v852_v39 }
 0x420   : > { %v828_v41 = vadd.f32 1.0, %v2777_v40 }
 0x422   : > { %2780 = vrcp.f32 %v828_v41 }
 0x42c   : > { %v2779_v42 = vpop.eup %2778 }
 0x42d   : > { %v856_v48 = vmul.f32 %v2779_v42, %v3383_v4 }
 0x42f   : > { %v2781_v45 = vpop.eup %2780 }
 0x430   : > { %v832_v51 = vmul.f32 %v2781_v45, %v3386_v7 }
 0x48a   : > { %v859_v43 = vpop.permute.xlu0 %858 }
 0x48b   : > { %v861_v44 = vmul.f32 %v2779_v42, %v859_v43 }
 0x48d   : > { %863 = vrot.lane.b32.xlu0 %v861_v44, %s3104_s16 }
 0x48e   : > { %v835_v46 = vpop.permute.xlu1 %834 }
 0x48f   : > { %v837_v47 = vmul.f32 %v2781_v45, %v835_v46 }
 0x491   : > { %839 = vrot.lane.b32.xlu1 %v837_v47, %s3104_s16 }
 0x4ff   : > { %v864_v49 = vpop.permute.xlu0 %863 }
 0x500   : > { %v3422_v50 = vadd.f32 %v864_v49, %v856_v48  ;;  %v1089_v49 = vld [vmem:[#allocation2 + $0x3] sm:$0x1] }
 0x502   : > { %2782 = vtanh.f32 %v3422_v50 }
 0x503   : > { %v840_v52 = vpop.permute.xlu1 %839 }
 0x504   : > { %v3426_v53 = vadd.f32 %v840_v52, %v832_v51 }
 0x506   : > { %2784 = vtanh.f32 %v3426_v53 }
 0x50f   : > { %v2783_v54 = vpop.eup %2782 }
 0x510   : > { %869 = vrot.lane.b32.xlu0 %v2783_v54, %s3103_s14 }
 0x513   : > { %v2785_v55 = vpop.eup %2784 }
 0x514   : > { %845 = vrot.lane.b32.xlu1 %v2785_v55, %s3103_s14 }
 0x582   : > { %v870_v56 = vpop.permute.xlu0 %869 }
 0x583   : > { %v872_v57 = vmul.f32 %v2779_v42, %v870_v56 }
 0x585   : > { %879 = vrot.lane.b32.xlu0 %v872_v57, %s3104_s16 }
 0x586   : > { %v846_v58 = vpop.permute.xlu1 %845 }
 0x587   : > { %v848_v59 = vmul.f32 %v2781_v45, %v846_v58  ;;  %v1163_v45 = vld [vmem:[#allocation3 + $0x4] sm:$0x1] }
 0x589   : > { %874 = vrot.lane.b32.xlu1 %v848_v59, %s3104_s16 }
 0x5f7   : > { %v880_v60 = vpop.permute.xlu0 %879 }
 0x5f8   : > { %882 = vst.msk [vmem:[#allocation5 + $0x6] sm:$0x1] %vm670_vm2, %v880_v60  ;;  %2528 = vmatmul.mubr.msk.f32.vlgmr.msra.gmra.mxu0 %vm471_vm3, %v880_v60 }
 0x5f9   : > { %2542 = vmatpush3.msra.mxu0 %v3318_v11  ;;  %2549 = vmatprep.mubr.msk.f32.mxu0 %vm3102_vm0, %v3101_v0 }
 0x5fa   : > { %2543 = vmatprep.subr.mxu0 %v3101_v0 }
 0x5fb   : > { %2544 = vmatpush3.msra.mxu0 %v3321_v13  ;;  %v875_v61 = vpop.permute.xlu1 %874 }
 0x5fc   : > { %2545 = vmatprep.subr.mxu0 %v3101_v0  ;;  %877 = vst.msk [vmem:[#allocation4 + $0x1] sm:$0x1] %vm670_vm2, %v875_v61  ;;  %2517 = vmatmul.mubr.msk.f32.vlgmr.msra.gmra.mxu1 %vm471_vm3, %v875_v61 }
 0x5fd   : > { %2546 = vmatpush3.msra.mxu0 %v3324_v15  ;;  %2531 = vmatpush3.msra.mxu1 %v3334_v24 }
 0x5fe   : > { %2547 = vmatprep.subr.mxu0 %v3101_v0  ;;  %2532 = vmatprep.subr.mxu1 %v3101_v0 }
 0x5ff   : > { %2548 = vmatpush3.msra.mxu0 %v3328_v18  ;;  %2533 = vmatpush3.msra.mxu1 %v3339_v27 }
 0x600   : > { %2538 = vmatprep.mubr.msk.f32.mxu1 %vm3102_vm0, %v3101_v0  ;;  %2534 = vmatprep.subr.mxu1 %v3101_v0 }
 0x601   : > { %2563 = vmatprep.subr.mxu0 %v3101_v0  ;;  %2535 = vmatpush3.msra.mxu1 %v3346_v28 }
 0x602   : > { %2536 = vmatprep.subr.mxu1 %v3101_v0 }
 0x603   : > { %2537 = vmatpush3.msra.mxu1 %v3353_v29 }
 0x604   : > { %2552 = vmatprep.subr.mxu1 %v3101_v0 }
 0x6b8   : > { %v1026_v63 = vpop.f32.mrf.mxu0 }
 0x6b9   : > { %v1030_v1 = vadd.f32 %v1026_v63, %v957_v62 }
 0x6ba   : > { %v2529_v2 = vpop.f32.mrf.mxu0 }
 0x6bb   : > { %2786 = vtanh.f32 %v1030_v1  ;;  %v1055_v9 = vsub.f32 0.0, %v1030_v1 }
 0x6bc   : > { %v952_v4 = vpop.f32.mrf.mxu1 }
 0x6bd   : > { %v956_v5 = vadd.f32 %v952_v4, %v883_v3  ;;  %v1056_v10 = vmul.f32 1.442695, %v1055_v9 }
 0x6be   : > { %v2518_v6 = vpop.f32.mrf.mxu1 }
 0x6bf   : > { %2788 = vtanh.f32 %v956_v5  ;;  %v1031_v12 = vsub.f32 0.0, %v956_v5 }
 0x6c0   : > { %2790 = vpow2.f32 %v1056_v10 }
 0x6c1   : > { %v1032_v14 = vmul.f32 1.442695, %v1031_v12 }
 0x6c3   : > { %2792 = vpow2.f32 %v1032_v14 }
 0x6c8   : > { %v2787_v7 = vpop.eup %2786 }
 0x6c9   : > { %1064 = vrot.lane.b32.xlu0 %v2787_v7, %s3103_s14 }
 0x6cc   : > { %v2789_v8 = vpop.eup %2788 }
 0x6cd   : > { %1040 = vrot.lane.b32.xlu1 %v2789_v8, %s3103_s14  ;;  %v2791_v16 = vpop.eup %2790 }
 0x6ce   : > { %v1058_v17 = vadd.f32 1.0, %v2791_v16 }
 0x6d0   : > { %v2793_v19 = vpop.eup %2792  ;;  %2794 = vrcp.f32 %v1058_v17 }
 0x6d1   : > { %v1034_v20 = vadd.f32 1.0, %v2793_v19 }
 0x6d3   : > { %2796 = vrcp.f32 %v1034_v20 }
 0x6dd   : > { %v2795_v21 = vpop.eup %2794 }
 0x6de   : > { %v1062_v31 = vmul.f32 %v2795_v21, %v3422_v50 }
 0x6e0   : > { %v2797_v25 = vpop.eup %2796 }
 0x6e1   : > { %v1038_v34 = vmul.f32 %v2797_v25, %v3426_v53 }
 0x73b   : > { %v1065_v22 = vpop.permute.xlu0 %1064 }
 0x73c   : > { %v1067_v23 = vmul.f32 %v2795_v21, %v1065_v22 }
 0x73e   : > { %1069 = vrot.lane.b32.xlu0 %v1067_v23, %s3104_s16 }
 0x73f   : > { %v1041_v26 = vpop.permute.xlu1 %1040 }
 0x740   : > { %v1043_v30 = vmul.f32 %v2797_v25, %v1041_v26 }
 0x742   : > { %1045 = vrot.lane.b32.xlu1 %v1043_v30, %s3104_s16 }
 0x7b0   : > { %v1070_v32 = vpop.permute.xlu0 %1069 }
 0x7b1   : > { %v3462_v33 = vadd.f32 %v1070_v32, %v1062_v31  ;;  %v1295_v32 = vld [vmem:[#allocation2 + $0x4] sm:$0x1] }
 0x7b3   : > { %2798 = vtanh.f32 %v3462_v33 }
 0x7b4   : > { %v1046_v35 = vpop.permute.xlu1 %1045 }
 0x7b5   : > { %v3466_v36 = vadd.f32 %v1046_v35, %v1038_v34 }
 0x7b7   : > { %2800 = vtanh.f32 %v3466_v36 }
 0x7c0   : > { %v2799_v37 = vpop.eup %2798 }
 0x7c1   : > { %1075 = vrot.lane.b32.xlu0 %v2799_v37, %s3103_s14 }
 0x7c4   : > { %v2801_v38 = vpop.eup %2800 }
 0x7c5   : > { %1051 = vrot.lane.b32.xlu1 %v2801_v38, %s3103_s14 }
 0x833   : > { %v1076_v39 = vpop.permute.xlu0 %1075 }
 0x834   : > { %v1078_v40 = vmul.f32 %v2795_v21, %v1076_v39 }
 0x836   : > { %1085 = vrot.lane.b32.xlu0 %v1078_v40, %s3104_s16 }
 0x837   : > { %v1052_v41 = vpop.permute.xlu1 %1051 }
 0x838   : > { %v1054_v42 = vmul.f32 %v2797_v25, %v1052_v41  ;;  %v1369_v25 = vld [vmem:[#allocation3 + $0x3] sm:$0x1] }
 0x83a   : > { %1080 = vrot.lane.b32.xlu1 %v1054_v42, %s3104_s16 }
 0x8a8   : > { %v1086_v43 = vpop.permute.xlu0 %1085 }
 0x8a9   : > { %1088 = vst.msk [vmem:[#allocation5 + $0x5] sm:$0x1] %vm670_vm2, %v1086_v43  ;;  %2550 = vmatmul.mubr.msk.f32.vlgmr.msra.gmra.mxu0 %vm471_vm3, %v1086_v43 }
 0x8aa   : > { %2564 = vmatpush3.msra.mxu0 %v3318_v11  ;;  %2571 = vmatprep.mubr.msk.f32.mxu0 %vm3102_vm0, %v3101_v0 }
 0x8ab   : > { %2565 = vmatprep.subr.mxu0 %v3101_v0 }
 0x8ac   : > { %2566 = vmatpush3.msra.mxu0 %v3321_v13  ;;  %v1081_v44 = vpop.permute.xlu1 %1080 }
 0x8ad   : > { %2567 = vmatprep.subr.mxu0 %v3101_v0  ;;  %1083 = vst.msk [vmem:[#allocation4 + $0x2] sm:$0x1] %vm670_vm2, %v1081_v44  ;;  %2539 = vmatmul.mubr.msk.f32.vlgmr.msra.gmra.mxu1 %vm471_vm3, %v1081_v44 }
 0x8ae   : > { %2568 = vmatpush3.msra.mxu0 %v3324_v15  ;;  %2553 = vmatpush3.msra.mxu1 %v3334_v24 }
 0x8af   : > { %2569 = vmatprep.subr.mxu0 %v3101_v0  ;;  %2554 = vmatprep.subr.mxu1 %v3101_v0 }
 0x8b0   : > { %2570 = vmatpush3.msra.mxu0 %v3328_v18  ;;  %2555 = vmatpush3.msra.mxu1 %v3339_v27 }
 0x8b1   : > { %2560 = vmatprep.mubr.msk.f32.mxu1 %vm3102_vm0, %v3101_v0  ;;  %2556 = vmatprep.subr.mxu1 %v3101_v0 }
 0x8b2   : > { %2585 = vmatprep.subr.mxu0 %v3101_v0  ;;  %2557 = vmatpush3.msra.mxu1 %v3346_v28 }
 0x8b3   : > { %2558 = vmatprep.subr.mxu1 %v3101_v0 }
 0x8b4   : > { %2559 = vmatpush3.msra.mxu1 %v3353_v29 }
 0x8b5   : > { %2574 = vmatprep.subr.mxu1 %v3101_v0 }
 0x969   : > { %v1232_v46 = vpop.f32.mrf.mxu0 }
 0x96a   : > { %v1236_v47 = vadd.f32 %v1232_v46, %v1163_v45 }
 0x96b   : > { %v2551_v48 = vpop.f32.mrf.mxu0 }
 0x96c   : > { %2802 = vtanh.f32 %v1236_v47  ;;  %v1261_v55 = vsub.f32 0.0, %v1236_v47 }
 0x96d   : > { %v1158_v50 = vpop.f32.mrf.mxu1 }
 0x96e   : > { %v1162_v51 = vadd.f32 %v1158_v50, %v1089_v49  ;;  %v1262_v56 = vmul.f32 1.442695, %v1261_v55 }
 0x96f   : > { %v2540_v52 = vpop.f32.mrf.mxu1 }
 0x970   : > { %2804 = vtanh.f32 %v1162_v51  ;;  %v1237_v57 = vsub.f32 0.0, %v1162_v51 }
 0x971   : > { %2806 = vpow2.f32 %v1262_v56 }
 0x972   : > { %v1238_v58 = vmul.f32 1.442695, %v1237_v57 }
 0x974   : > { %2808 = vpow2.f32 %v1238_v58 }
 0x979   : > { %v2803_v53 = vpop.eup %2802 }
 0x97a   : > { %1270 = vrot.lane.b32.xlu0 %v2803_v53, %s3103_s14 }
 0x97d   : > { %v2805_v54 = vpop.eup %2804 }
 0x97e   : > { %1246 = vrot.lane.b32.xlu1 %v2805_v54, %s3103_s14  ;;  %v2807_v59 = vpop.eup %2806 }
 0x97f   : > { %v1264_v60 = vadd.f32 1.0, %v2807_v59 }
 0x981   : > { %v2809_v61 = vpop.eup %2808  ;;  %2810 = vrcp.f32 %v1264_v60 }
 0x982   : > { %v1240_v62 = vadd.f32 1.0, %v2809_v61 }
 0x984   : > { %2812 = vrcp.f32 %v1240_v62 }
 0x98e   : > { %v2811_v63 = vpop.eup %2810 }
 0x98f   : > { %v1268_v6 = vmul.f32 %v2811_v63, %v3462_v33 }
 0x991   : > { %v2813_v3 = vpop.eup %2812 }
 0x992   : > { %v1244_v9 = vmul.f32 %v2813_v3, %v3466_v36 }
 0x9ec   : > { %v1271_v1 = vpop.permute.xlu0 %1270 }
 0x9ed   : > { %v1273_v2 = vmul.f32 %v2811_v63, %v1271_v1 }
 0x9ef   : > { %1275 = vrot.lane.b32.xlu0 %v1273_v2, %s3104_s16 }
 0x9f0   : > { %v1247_v4 = vpop.permute.xlu1 %1246 }
 0x9f1   : > { %v1249_v5 = vmul.f32 %v2813_v3, %v1247_v4 }
 0x9f3   : > { %1251 = vrot.lane.b32.xlu1 %v1249_v5, %s3104_s16 }
 0xa61   : > { %v1276_v7 = vpop.permute.xlu0 %1275 }
 0xa62   : > { %v3502_v8 = vadd.f32 %v1276_v7, %v1268_v6 }
 0xa64   : > { %2814 = vtanh.f32 %v3502_v8 }
 0xa65   : > { %v1252_v10 = vpop.permute.xlu1 %1251 }
 0xa66   : > { %v3506_v12 = vadd.f32 %v1252_v10, %v1244_v9 }
 0xa68   : > { %2816 = vtanh.f32 %v3506_v12 }
 0xa71   : > { %v2815_v14 = vpop.eup %2814 }
 0xa72   : > { %1281 = vrot.lane.b32.xlu0 %v2815_v14, %s3103_s14 }
 0xa75   : > { %v2817_v16 = vpop.eup %2816 }
 0xa76   : > { %1257 = vrot.lane.b32.xlu1 %v2817_v16, %s3103_s14 }
 0xae4   : > { %v1282_v17 = vpop.permute.xlu0 %1281 }
 0xae5   : > { %v1284_v19 = vmul.f32 %v2811_v63, %v1282_v17 }
 0xae7   : > { %1291 = vrot.lane.b32.xlu0 %v1284_v19, %s3104_s16 }
 0xae8   : > { %v1258_v20 = vpop.permute.xlu1 %1257 }
 0xae9   : > { %v1260_v21 = vmul.f32 %v2813_v3, %v1258_v20  ;;  %v1501_v3 = vld [vmem:[#allocation2 + $0x5] sm:$0x1] }
 0xaeb   : > { %1286 = vrot.lane.b32.xlu1 %v1260_v21, %s3104_s16 }
 0xb59   : > { %v1292_v22 = vpop.permute.xlu0 %1291 }
 0xb5a   : > { %1294 = vst.msk [vmem:[#allocation5 + $0x4] sm:$0x1] %vm670_vm2, %v1292_v22  ;;  %2572 = vmatmul.mubr.msk.f32.vlgmr.msra.gmra.mxu0 %vm471_vm3, %v1292_v22 }
 0xb5b   : > { %2586 = vmatpush3.msra.mxu0 %v3318_v11  ;;  %2593 = vmatprep.mubr.msk.f32.mxu0 %vm3102_vm0, %v3101_v0 }
 0xb5c   : > { %2587 = vmatprep.subr.mxu0 %v3101_v0 }
 0xb5d   : > { %2588 = vmatpush3.msra.mxu0 %v3321_v13  ;;  %v1287_v23 = vpop.permute.xlu1 %1286 }
 0xb5e   : > { %2589 = vmatprep.subr.mxu0 %v3101_v0  ;;  %1289 = vst.msk [vmem:[#allocation4 + $0x3] sm:$0x1] %vm670_vm2, %v1287_v23  ;;  %2561 = vmatmul.mubr.msk.f32.vlgmr.msra.gmra.mxu1 %vm471_vm3, %v1287_v23 }
 0xb5f   : > { %2590 = vmatpush3.msra.mxu0 %v3324_v15  ;;  %2575 = vmatpush3.msra.mxu1 %v3334_v24 }
 0xb60   : > { %2591 = vmatprep.subr.mxu0 %v3101_v0  ;;  %2576 = vmatprep.subr.mxu1 %v3101_v0 }
 0xb61   : > { %2592 = vmatpush3.msra.mxu0 %v3328_v18  ;;  %2577 = vmatpush3.msra.mxu1 %v3339_v27 }
 0xb62   : > { %2582 = vmatprep.mubr.msk.f32.mxu1 %vm3102_vm0, %v3101_v0  ;;  %2578 = vmatprep.subr.mxu1 %v3101_v0 }
 0xb63   : > { %2607 = vmatprep.subr.mxu0 %v3101_v0  ;;  %2579 = vmatpush3.msra.mxu1 %v3346_v28 }
 0xb64   : > { %2580 = vmatprep.subr.mxu1 %v3101_v0 }
 0xb65   : > { %2581 = vmatpush3.msra.mxu1 %v3353_v29 }
 0xb66   : > { %2596 = vmatprep.subr.mxu1 %v3101_v0 }
 0xc1a   : > { %v1438_v26 = vpop.f32.mrf.mxu0 }
 0xc1b   : > { %v1442_v30 = vadd.f32 %v1438_v26, %v1369_v25 }
 0xc1c   : > { %v2573_v31 = vpop.f32.mrf.mxu0 }
 0xc1d   : > { %2818 = vtanh.f32 %v1442_v30  ;;  %v1467_v38 = vsub.f32 0.0, %v1442_v30 }
 0xc1e   : > { %v1364_v33 = vpop.f32.mrf.mxu1 }
 0xc1f   : > { %v1368_v34 = vadd.f32 %v1364_v33, %v1295_v32  ;;  %v1468_v39 = vmul.f32 1.442695, %v1467_v38 }
 0xc20   : > { %v2562_v35 = vpop.f32.mrf.mxu1 }
 0xc21   : > { %2820 = vtanh.f32 %v1368_v34  ;;  %v1443_v40 = vsub.f32 0.0, %v1368_v34 }
 0xc22   : > { %2822 = vpow2.f32 %v1468_v39 }
 0xc23   : > { %v1444_v41 = vmul.f32 1.442695, %v1443_v40 }
 0xc25   : > { %2824 = vpow2.f32 %v1444_v41 }
 0xc2a   : > { %v2819_v36 = vpop.eup %2818 }
 0xc2b   : > { %1476 = vrot.lane.b32.xlu0 %v2819_v36, %s3103_s14 }
 0xc2e   : > { %v2821_v37 = vpop.eup %2820 }
 0xc2f   : > { %1452 = vrot.lane.b32.xlu1 %v2821_v37, %s3103_s14  ;;  %v2823_v42 = vpop.eup %2822 }
 0xc30   : > { %v1470_v43 = vadd.f32 1.0, %v2823_v42 }
 0xc32   : > { %v2825_v44 = vpop.eup %2824  ;;  %2826 = vrcp.f32 %v1470_v43 }
 0xc33   : > { %v1446_v45 = vadd.f32 1.0, %v2825_v44  ;;  %v2882_v44 = vld [vmem:[#allocation12 + $0x18] sm:$0xff] }
 0xc35   : > { %2828 = vrcp.f32 %v1446_v45  ;;  %v2883_v45 = vld [vmem:[#allocation12 + $0x10] sm:$0xff] }
 0xc3f   : > { %v2827_v46 = vpop.eup %2826 }
 0xc40   : > { %v1474_v52 = vmul.f32 %v2827_v46, %v3502_v8 }
 0xc42   : > { %v2829_v49 = vpop.eup %2828 }
 0xc43   : > { %v1450_v55 = vmul.f32 %v2829_v49, %v3506_v12 }
 0xc9d   : > { %v1477_v47 = vpop.permute.xlu0 %1476 }
 0xc9e   : > { %v1479_v48 = vmul.f32 %v2827_v46, %v1477_v47  ;;  %v2884_v47 = vld [vmem:[#allocation12 + $0x8] sm:$0xff] }
 0xca0   : > { %1481 = vrot.lane.b32.xlu0 %v1479_v48, %s3104_s16  ;;  %v2885_v48 = vld [vmem:[#allocation12] sm:$0xff] }
 0xca1   : > { %v1453_v50 = vpop.permute.xlu1 %1452 }
 0xca2   : > { %v1455_v51 = vmul.f32 %v2829_v49, %v1453_v50 }
 0xca4   : > { %1457 = vrot.lane.b32.xlu1 %v1455_v51, %s3104_s16 }
 0xd12   : > { %v1482_v53 = vpop.permute.xlu0 %1481 }
 0xd13   : > { %v3542_v54 = vadd.f32 %v1482_v53, %v1474_v52  ;;  %v1707_v52 = vld [vmem:[#allocation2 + $0x6] sm:$0x1] }
 0xd15   : > { %2830 = vtanh.f32 %v3542_v54 }
 0xd16   : > { %v1458_v56 = vpop.permute.xlu1 %1457 }
 0xd17   : > { %v3546_v57 = vadd.f32 %v1458_v56, %v1450_v55 }
 0xd19   : > { %2832 = vtanh.f32 %v3546_v57 }
 0xd22   : > { %v2831_v58 = vpop.eup %2830 }
 0xd23   : > { %1487 = vrot.lane.b32.xlu0 %v2831_v58, %s3103_s14 }
 0xd26   : > { %v2833_v59 = vpop.eup %2832 }
 0xd27   : > { %1463 = vrot.lane.b32.xlu1 %v2833_v59, %s3103_s14 }
 0xd95   : > { %v1488_v60 = vpop.permute.xlu0 %1487 }
 0xd96   : > { %v1490_v61 = vmul.f32 %v2827_v46, %v1488_v60 }
 0xd98   : > { %1497 = vrot.lane.b32.xlu0 %v1490_v61, %s3104_s16 }
 0xd99   : > { %v1464_v62 = vpop.permute.xlu1 %1463 }
 0xd9a   : > { %v1466_v63 = vmul.f32 %v2829_v49, %v1464_v62 }
 0xd9c   : > { %1492 = vrot.lane.b32.xlu1 %v1466_v63, %s3104_s16 }
 0xe0a   : > { %v1498_v1 = vpop.permute.xlu0 %1497 }
 0xe0b   : > { %1500 = vst.msk [vmem:[#allocation5 + $0x3] sm:$0x1] %vm670_vm2, %v1498_v1  ;;  %2594 = vmatmul.mubr.msk.f32.vlgmr.msra.gmra.mxu0 %vm471_vm3, %v1498_v1 }
 0xe0c   : > { %2608 = vmatpush3.msra.mxu0 %v3318_v11  ;;  %2615 = vmatprep.mubr.msk.f32.mxu0 %vm3102_vm0, %v3101_v0  ;;  %v1575_v11 = vld [vmem:[#allocation3 + $0x2] sm:$0x1] }
 0xe0d   : > { %2609 = vmatprep.subr.mxu0 %v3101_v0 }
 0xe0e   : > { %2610 = vmatpush3.msra.mxu0 %v3321_v13  ;;  %v1493_v2 = vpop.permute.xlu1 %1492 }
 0xe0f   : > { %2611 = vmatprep.subr.mxu0 %v3101_v0  ;;  %1495 = vst.msk [vmem:[#allocation4 + $0x4] sm:$0x1] %vm670_vm2, %v1493_v2  ;;  %2583 = vmatmul.mubr.msk.f32.vlgmr.msra.gmra.mxu1 %vm471_vm3, %v1493_v2 }
 0xe10   : > { %2612 = vmatpush3.msra.mxu0 %v3324_v15  ;;  %2597 = vmatpush3.msra.mxu1 %v3334_v24 }
 0xe11   : > { %2613 = vmatprep.subr.mxu0 %v3101_v0  ;;  %2598 = vmatprep.subr.mxu1 %v3101_v0 }
 0xe12   : > { %2614 = vmatpush3.msra.mxu0 %v3328_v18  ;;  %2599 = vmatpush3.msra.mxu1 %v3339_v27 }
 0xe13   : > { %2604 = vmatprep.mubr.msk.f32.mxu1 %vm3102_vm0, %v3101_v0  ;;  %2600 = vmatprep.subr.mxu1 %v3101_v0 }
 0xe14   : > { %2629 = vmatprep.subr.mxu0 %v3101_v0  ;;  %2601 = vmatpush3.msra.mxu1 %v3346_v28 }
 0xe15   : > { %2602 = vmatprep.subr.mxu1 %v3101_v0 }
 0xe16   : > { %2603 = vmatpush3.msra.mxu1 %v3353_v29 }
 0xe17   : > { %2618 = vmatprep.subr.mxu1 %v3101_v0 }
 0xecb   : > { %v1644_v13 = vpop.f32.mrf.mxu0 }
 0xecc   : > { %v1648_v15 = vadd.f32 %v1644_v13, %v1575_v11 }
 0xecd   : > { %v2595_v18 = vpop.f32.mrf.mxu0 }
 0xece   : > { %2834 = vtanh.f32 %v1648_v15  ;;  %v1673_v9 = vsub.f32 0.0, %v1648_v15 }
 0xecf   : > { %v1570_v4 = vpop.f32.mrf.mxu1 }
 0xed0   : > { %v1574_v5 = vadd.f32 %v1570_v4, %v1501_v3  ;;  %v1674_v10 = vmul.f32 1.442695, %v1673_v9 }
 0xed1   : > { %v2584_v6 = vpop.f32.mrf.mxu1 }
 0xed2   : > { %2836 = vtanh.f32 %v1574_v5  ;;  %v1649_v12 = vsub.f32 0.0, %v1574_v5 }
 0xed3   : > { %2838 = vpow2.f32 %v1674_v10 }
 0xed4   : > { %v1650_v14 = vmul.f32 1.442695, %v1649_v12 }
 0xed6   : > { %2840 = vpow2.f32 %v1650_v14 }
 0xedb   : > { %v2835_v7 = vpop.eup %2834 }
 0xedc   : > { %1682 = vrot.lane.b32.xlu0 %v2835_v7, %s3103_s14 }
 0xedf   : > { %v2837_v8 = vpop.eup %2836 }
 0xee0   : > { %1658 = vrot.lane.b32.xlu1 %v2837_v8, %s3103_s14  ;;  %v2839_v16 = vpop.eup %2838 }
 0xee1   : > { %v1676_v17 = vadd.f32 1.0, %v2839_v16 }
 0xee3   : > { %v2841_v19 = vpop.eup %2840  ;;  %2842 = vrcp.f32 %v1676_v17 }
 0xee4   : > { %v1652_v20 = vadd.f32 1.0, %v2841_v19 }
 0xee6   : > { %2844 = vrcp.f32 %v1652_v20  ;;  %v1987_v20 = vld [vmem:[#allocation3] sm:$0x1] }
 0xef0   : > { %v2843_v21 = vpop.eup %2842 }
 0xef1   : > { %v1680_v31 = vmul.f32 %v2843_v21, %v3542_v54 }
 0xef3   : > { %v2845_v25 = vpop.eup %2844 }
 0xef4   : > { %v1656_v34 = vmul.f32 %v2845_v25, %v3546_v57 }
 0xf4e   : > { %v1683_v22 = vpop.permute.xlu0 %1682 }
 0xf4f   : > { %v1685_v23 = vmul.f32 %v2843_v21, %v1683_v22 }
 0xf51   : > { %1687 = vrot.lane.b32.xlu0 %v1685_v23, %s3104_s16 }
 0xf52   : > { %v1659_v26 = vpop.permute.xlu1 %1658 }
 0xf53   : > { %v1661_v30 = vmul.f32 %v2845_v25, %v1659_v26 }
 0xf55   : > { %1663 = vrot.lane.b32.xlu1 %v1661_v30, %s3104_s16 }
 0xfc3   : > { %v1688_v32 = vpop.permute.xlu0 %1687 }
 0xfc4   : > { %v3582_v33 = vadd.f32 %v1688_v32, %v1680_v31 }
 0xfc6   : > { %2846 = vtanh.f32 %v3582_v33 }
 0xfc7   : > { %v1664_v35 = vpop.permute.xlu1 %1663 }
 0xfc8   : > { %v3586_v36 = vadd.f32 %v1664_v35, %v1656_v34 }
 0xfca   : > { %2848 = vtanh.f32 %v3586_v36 }
 0xfd3   : > { %v2847_v37 = vpop.eup %2846 }
 0xfd4   : > { %1693 = vrot.lane.b32.xlu0 %v2847_v37, %s3103_s14 }
 0xfd7   : > { %v2849_v38 = vpop.eup %2848 }
 0xfd8   : > { %1669 = vrot.lane.b32.xlu1 %v2849_v38, %s3103_s14 }
0x1046   : > { %v1694_v39 = vpop.permute.xlu0 %1693 }
0x1047   : > { %v1696_v40 = vmul.f32 %v2843_v21, %v1694_v39 }
0x1049   : > { %1703 = vrot.lane.b32.xlu0 %v1696_v40, %s3104_s16 }
0x104a   : > { %v1670_v41 = vpop.permute.xlu1 %1669 }
0x104b   : > { %v1672_v42 = vmul.f32 %v2845_v25, %v1670_v41  ;;  %v1913_v25 = vld [vmem:[#allocation2 + $0x7] sm:$0x1] }
0x104d   : > { %1698 = vrot.lane.b32.xlu1 %v1672_v42, %s3104_s16 }
0x10bb   : > { %v1704_v43 = vpop.permute.xlu0 %1703 }
0x10bc   : > { %1706 = vst.msk [vmem:[#allocation5 + $0x2] sm:$0x1] %vm670_vm2, %v1704_v43  ;;  %2616 = vmatmul.mubr.msk.f32.vlgmr.msra.gmra.mxu0 %vm471_vm3, %v1704_v43 }
0x10bd   : > { %2630 = vmatpush3.msra.mxu0 %v2882_v44  ;;  %2637 = vmatprep.mubr.msk.f32.mxu0 %vm3102_vm0, %v3101_v0 }
0x10be   : > { %2631 = vmatprep.subr.mxu0 %v3101_v0 }
0x10bf   : > { %2632 = vmatpush3.msra.mxu0 %v2883_v45  ;;  %v1699_v46 = vpop.permute.xlu1 %1698 }
0x10c0   : > { %2633 = vmatprep.subr.mxu0 %v3101_v0  ;;  %1701 = vst.msk [vmem:[#allocation4 + $0x5] sm:$0x1] %vm670_vm2, %v1699_v46  ;;  %2605 = vmatmul.mubr.msk.f32.vlgmr.msra.gmra.mxu1 %vm471_vm3, %v1699_v46 }
0x10c1   : > { %2634 = vmatpush3.msra.mxu0 %v2884_v47  ;;  %2619 = vmatpush3.msra.mxu1 %v3334_v24  ;;  %v1781_v24 = vld [vmem:[#allocation3 + $0x1] sm:$0x1] }
0x10c2   : > { %2635 = vmatprep.subr.mxu0 %v3101_v0  ;;  %2620 = vmatprep.subr.mxu1 %v3101_v0 }
0x10c3   : > { %2636 = vmatpush3.msra.mxu0 %v2885_v48  ;;  %2621 = vmatpush3.msra.mxu1 %v3339_v27 }
0x10c4   : > { %2626 = vmatprep.mubr.msk.f32.mxu1 %vm3102_vm0, %v3101_v0  ;;  %2622 = vmatprep.subr.mxu1 %v3101_v0 }
0x10c5   : > { %2623 = vmatpush3.msra.mxu1 %v3346_v28 }
0x10c6   : > { %2624 = vmatprep.subr.mxu1 %v3101_v0 }
0x10c7   : > { %2625 = vmatpush3.msra.mxu1 %v3353_v29 }
0x10c8   : > { %2640 = vmatprep.subr.mxu1 %v3101_v0 }
0x117c   : > { %v1850_v49 = vpop.f32.mrf.mxu0 }
0x117d   : > { %v1854_v50 = vadd.f32 %v1850_v49, %v1781_v24 }
0x117e   : > { %v2617_v51 = vpop.f32.mrf.mxu0 }
0x117f   : > { %2850 = vtanh.f32 %v1854_v50  ;;  %v1879_v56 = vsub.f32 0.0, %v1854_v50 }
0x1180   : > { %v1776_v27 = vpop.f32.mrf.mxu1 }
0x1181   : > { %v1780_v53 = vadd.f32 %v1776_v27, %v1707_v52  ;;  %v1880_v29 = vmul.f32 1.442695, %v1879_v56  ;;  %v2131_v56 = vld [vmem:[#allocation14 + $0x28] sm:$0xff] }
0x1182   : > { %v2606_v54 = vpop.f32.mrf.mxu1 }
0x1183   : > { %2852 = vtanh.f32 %v1780_v53  ;;  %v1855_v57 = vsub.f32 0.0, %v1780_v53  ;;  %v2133_v54 = vld [vmem:[#allocation14 + $0x38] sm:$0xff] }
0x1184   : > { %2854 = vpow2.f32 %v1880_v29 }
0x1185   : > { %v1856_v58 = vmul.f32 1.442695, %v1855_v57  ;;  %v2130_v57 = vld [vmem:[#allocation14 + $0x20] sm:$0xff] }
0x1187   : > { %2856 = vpow2.f32 %v1856_v58  ;;  %v2129_v58 = vld [vmem:[#allocation14 + $0x18] sm:$0xff] }
0x118c   : > { %v2851_v55 = vpop.eup %2850 }
0x118d   : > { %1888 = vrot.lane.b32.xlu0 %v2851_v55, %s3103_s14  ;;  %v2132_v55 = vld [vmem:[#allocation14 + $0x30] sm:$0xff] }
0x1190   : > { %v2853_v28 = vpop.eup %2852 }
0x1191   : > { %1864 = vrot.lane.b32.xlu1 %v2853_v28, %s3103_s14  ;;  %v2855_v59 = vpop.eup %2854 }
0x1192   : > { %v1882_v60 = vadd.f32 1.0, %v2855_v59 }
0x1194   : > { %v2857_v61 = vpop.eup %2856  ;;  %2858 = vrcp.f32 %v1882_v60 }
0x1195   : > { %v1858_v62 = vadd.f32 1.0, %v2857_v61  ;;  %v2128_v61 = vld [vmem:[#allocation14 + $0x10] sm:$0xff] }
0x1197   : > { %2860 = vrcp.f32 %v1858_v62  ;;  %v2127_v62 = vld [vmem:[#allocation14 + $0x8] sm:$0xff] }
0x11a1   : > { %v2859_v63 = vpop.eup %2858 }
0x11a2   : > { %v1886_v18 = vmul.f32 %v2859_v63, %v3582_v33 }
0x11a4   : > { %v2861_v11 = vpop.eup %2860 }
0x11a5   : > { %v1862_v5 = vmul.f32 %v2861_v11, %v3586_v36 }
0x11ff   : > { %v1889_v1 = vpop.permute.xlu0 %1888 }
0x1200   : > { %v1891_v2 = vmul.f32 %v2859_v63, %v1889_v1 }
0x1202   : > { %1893 = vrot.lane.b32.xlu0 %v1891_v2, %s3104_s16 }
0x1203   : > { %v1865_v13 = vpop.permute.xlu1 %1864 }
0x1204   : > { %v1867_v15 = vmul.f32 %v2861_v11, %v1865_v13 }
0x1206   : > { %1869 = vrot.lane.b32.xlu1 %v1867_v15, %s3104_s16 }
0x1274   : > { %v1894_v3 = vpop.permute.xlu0 %1893 }
0x1275   : > { %v1896_v4 = vadd.f32 %v1894_v3, %v1886_v18 }
0x1277   : > { %2862 = vtanh.f32 %v1896_v4 }
0x1278   : > { %v1870_v6 = vpop.permute.xlu1 %1869 }
0x1279   : > { %v1872_v7 = vadd.f32 %v1870_v6, %v1862_v5 }
0x127b   : > { %2864 = vtanh.f32 %v1872_v7 }
0x1284   : > { %v2863_v8 = vpop.eup %2862 }
0x1285   : > { %1899 = vrot.lane.b32.xlu0 %v2863_v8, %s3103_s14 }
0x1288   : > { %v2865_v9 = vpop.eup %2864 }
0x1289   : > { %1875 = vrot.lane.b32.xlu1 %v2865_v9, %s3103_s14 }
0x12f7   : > { %v1900_v10 = vpop.permute.xlu0 %1899 }
0x12f8   : > { %v1902_v12 = vmul.f32 %v2859_v63, %v1900_v10  ;;  %v2126_v63 = vld [vmem:[#allocation14] sm:$0xff] }
0x12fa   : > { %1909 = vrot.lane.b32.xlu0 %v1902_v12, %s3104_s16 }
0x12fb   : > { %v1876_v14 = vpop.permute.xlu1 %1875 }
0x12fc   : > { %v1878_v16 = vmul.f32 %v2861_v11, %v1876_v14 }
0x12fe   : > { %1904 = vrot.lane.b32.xlu1 %v1878_v16, %s3104_s16 }
0x136c   : > { %v1910_v17 = vpop.permute.xlu0 %1909 }
0x136d   : > { %1912 = vst.msk [vmem:[#allocation5 + $0x1] sm:$0x1] %vm670_vm2, %v1910_v17  ;;  %2638 = vmatmul.mubr.msk.f32.vlgmr.msra.gmra.mxu0 %vm471_vm3, %v1910_v17 }
0x1370   : > { %v1905_v19 = vpop.permute.xlu1 %1904 }
0x1371   : > { %1907 = vst.msk [vmem:[#allocation4 + $0x6] sm:$0x1] %vm670_vm2, %v1905_v19  ;;  %2627 = vmatmul.mubr.msk.f32.vlgmr.msra.gmra.mxu1 %vm471_vm3, %v1905_v19 }
0x1372   : > { %2656 = vmatprep.mubr.msk.f32.mxu1 %vm3102_vm0, %v3101_v0  ;;  %2641 = vmatpush3.msra.mxu1 %v2133_v54 }
0x1373   : > { %2642 = vmatprep.subr.mxu1 %v3101_v0 }
0x1374   : > { %2643 = vmatpush3.msra.mxu1 %v2132_v55 }
0x1375   : > { %2644 = vmatprep.subr.mxu1 %v3101_v0 }
0x1376   : > { %2645 = vmatpush3.msra.mxu1 %v2131_v56 }
0x1377   : > { %2646 = vmatprep.subr.mxu1 %v3101_v0 }
0x1378   : > { %2647 = vmatpush3.msra.mxu1 %v2130_v57 }
0x1379   : > { %2648 = vmatprep.subr.mxu1 %v3101_v0 }
0x137a   : > { %2649 = vmatpush3.msra.mxu1 %v2129_v58 }
0x137b   : > { %2650 = vmatprep.subr.mxu1 %v3101_v0 }
0x137c   : > { %2651 = vmatpush3.msra.mxu1 %v2128_v61 }
0x137d   : > { %2652 = vmatprep.subr.mxu1 %v3101_v0 }
0x137e   : > { %2653 = vmatpush3.msra.mxu1 %v2127_v62 }
0x137f   : > { %2654 = vmatprep.subr.mxu1 %v3101_v0  ;;  %v2369_v0 = vld [vmem:[%s3699_s6] ss:$0 sm:$0xff] }
0x1380   : > { %2655 = vmatpush3.msra.mxu1 %v2126_v63 }
0x142d   : > { %v2056_v21 = vpop.f32.mrf.mxu0 }
0x142e   : > { %v2060_v22 = vadd.f32 %v2056_v21, %v1987_v20 }
0x142f   : > { %v2639_v23 = vpop.f32.mrf.mxu0 }
0x1430   : > { %2866 = vtanh.f32 %v2060_v22  ;;  %v2085_v34 = vsub.f32 0.0, %v2060_v22 }
0x1431   : > { %v1982_v26 = vpop.f32.mrf.mxu1 }
0x1432   : > { %v1986_v30 = vadd.f32 %v1982_v26, %v1913_v25  ;;  %v2086_v35 = vmul.f32 1.442695, %v2085_v34 }
0x1433   : > { %v2628_v31 = vpop.f32.mrf.mxu1 }
0x1434   : > { %2868 = vtanh.f32 %v1986_v30  ;;  %v2061_v36 = vsub.f32 0.0, %v1986_v30 }
0x1435   : > { %2870 = vpow2.f32 %v2086_v35 }
0x1436   : > { %v2062_v37 = vmul.f32 1.442695, %v2061_v36 }
0x1438   : > { %2872 = vpow2.f32 %v2062_v37 }
0x143d   : > { %v2867_v32 = vpop.eup %2866 }
0x143e   : > { %2094 = vrot.lane.b32.xlu0 %v2867_v32, %s3103_s14 }
0x1441   : > { %v2869_v33 = vpop.eup %2868 }
0x1442   : > { %2070 = vrot.lane.b32.xlu1 %v2869_v33, %s3103_s14  ;;  %v2871_v38 = vpop.eup %2870 }
0x1443   : > { %v2088_v39 = vadd.f32 1.0, %v2871_v38 }
0x1445   : > { %v2873_v40 = vpop.eup %2872  ;;  %2874 = vrcp.f32 %v2088_v39 }
0x1446   : > { %v2064_v41 = vadd.f32 1.0, %v2873_v40 }
0x1448   : > { %2876 = vrcp.f32 %v2064_v41 }
0x1452   : > { %v2875_v42 = vpop.eup %2874 }
0x1453   : > { %v2092_v48 = vmul.f32 %v2875_v42, %v1896_v4 }
0x1455   : > { %v2877_v45 = vpop.eup %2876 }
0x1456   : > { %v2068_v50 = vmul.f32 %v2877_v45, %v1872_v7 }
0x14b0   : > { %v2095_v43 = vpop.permute.xlu0 %2094 }
0x14b1   : > { %v2097_v44 = vmul.f32 %v2875_v42, %v2095_v43 }
0x14b3   : > { %2099 = vrot.lane.b32.xlu0 %v2097_v44, %s3104_s16 }
0x14b4   : > { %v2071_v46 = vpop.permute.xlu1 %2070 }
0x14b5   : > { %v2073_v47 = vmul.f32 %v2877_v45, %v2071_v46 }
0x14b7   : > { %2075 = vrot.lane.b32.xlu1 %v2073_v47, %s3104_s16 }
0x1525   : > { %v2100_v24 = vpop.permute.xlu0 %2099 }
0x1526   : > { %v2102_v49 = vadd.f32 %v2100_v24, %v2092_v48 }
0x1528   : > { %2878 = vtanh.f32 %v2102_v49 }
0x1529   : > { %v2076_v51 = vpop.permute.xlu1 %2075 }
0x152a   : > { %v2078_v52 = vadd.f32 %v2076_v51, %v2068_v50 }
0x152c   : > { %2880 = vtanh.f32 %v2078_v52 }
0x1535   : > { %v2879_v27 = vpop.eup %2878 }
0x1536   : > { %2105 = vrot.lane.b32.xlu0 %v2879_v27, %s3103_s14 }
0x1539   : > { %v2881_v53 = vpop.eup %2880 }
0x153a   : > { %2081 = vrot.lane.b32.xlu1 %v2881_v53, %s3103_s14 }
0x15a8   : > { %v2106_v28 = vpop.permute.xlu0 %2105 }
0x15a9   : > { %v2108_v29 = vmul.f32 %v2875_v42, %v2106_v28 }
0x15ab   : > { %2115 = vrot.lane.b32.xlu0 %v2108_v29, %s3104_s16 }
0x15ac   : > { %v2082_v59 = vpop.permute.xlu1 %2081 }
0x15ad   : > { %v2084_v60 = vmul.f32 %v2877_v45, %v2082_v59 }
0x15af   : > { %2110 = vrot.lane.b32.xlu1 %v2084_v60, %s3104_s16 }
0x161d   : > { %v2116_v1 = vpop.permute.xlu0 %2115 }
0x161e   : > { %2118 = vst.msk [vmem:[#allocation5] sm:$0x1] %vm670_vm2, %v2116_v1 }
0x1621   : > { %v2111_v2 = vpop.permute.xlu1 %2110 }
0x1622   : > { %2113 = vst.msk [vmem:[#allocation4 + $0x7] sm:$0x1] %vm670_vm2, %v2111_v2 }
0x1625   : > { %v2120_v11 = vld [vmem:[#allocation5] sm:$0xff] }
0x1626   : > { %2122 = vrot.lane.b32.xlu0 %v2120_v11, %s3104_s16 }
0x1629   : > { %v2119_v15 = vld [vmem:[#allocation4] sm:$0xff] }
0x1698   : > { %v2123_v13 = vpop.permute.xlu0 %2122 }
0x1699   : > { %v2125_v18 = vsel %vm471_vm3, %v2119_v15, %v2123_v13 }
0x169a   : > { %2657 = vmatmul.mubr.msk.f32.vlgmr.msra.gmra.mxu1 %vm2141_vm4, %v2125_v18 }
0x175a   : > { %v2211_v3 = vpop.f32.mrf.mxu1 }
0x175b   : > { %v2212_v4 = vadd.f32 %v2369_v0, %v2211_v3 }
0x175c   : > { %v2658_v5 = vpop.f32.mrf.mxu1 }
0x175d   : > { %2215 = vst [vmem:[%s351_s12] sm:$0xff] %v2212_v4 }
0x175e   : > { %3031 = shalt.err (!%p3028_p11)
}
0x175f   : > { %s3032_s20 = scalar_lea.hbm %s3656_s21, 128  ;;  %s3036_s16 = scalar_lea.hbm %s3700_s7, 256 }
0x1760   : > { %p3033_p13 = scmp.ne.s32.totalorder %s3656_s21, %s3032_s20  ;;  %p3037_p4 = scmp.lt.s32.totalorder %s3656_s21, %s3700_s7 }
0x1761   : > { %p3038_p6 = scmp.lt.s32.totalorder %s3036_s16, %s3032_s20 }
0x1762   : > { %p3034_p1 = pnand %p3033_p13, %p3722_p7 }
0x1763   : > { %p3039_p2 = por %p3038_p6, %p3037_p4 }
0x1764   : > { %p3035_p3 = pneg %p3034_p1 }
0x1766   : > { %p3040_p8 = pnand %p3039_p2, %p3035_p3 }
0x1768   : > { %3043 = shalt.err (!%p3040_p8)
}
0x1769   : > { %2677 = dma.vmem_to_hbm [thread:$0]  (%p3722_p7), %s2231_s29, 128, %s3656_s21, %s2217_s1  }
0x176a PF: > { %s2242_s11 = sand.u32 1, %s3078_s24   ;;  %p3723_p10 = scmp.ne.s32.totalorder %s3714_s28, 0 }
0x176b   : > { %p3724_p0 = scmp.ge.s32.totalorder %s3090_s27, 2  ;;  %s2243_s12 = scalar_lea.sflag [#allocation8], %s2242_s11 }
0x176d   : > { %p2697_p12 = pnand %p3724_p0, %p3723_p10 }
0x176f   : > { %p2698_p5 = pneg %p2697_p12 }
0x1771   : > { %3073 = dma.done.wait (%p2698_p5), %s2243_s12, 128  }
0x1772   : > { %3075 = vsyncadd (%p2698_p5), %s2243_s12, 4294967168  ;;  %p22_p9 = scmp.ge.s32.totalorder %s3231_s9, 4   ;;  %s3725_s24 = smov %s3082_s25 }
0x1773   : > { %s3726_s25 = smov %s3086_s26  ;;  %s3727_s26 = smov %s3242_s19 }
0x1774   : > { %s3728_s27 = smov %s3231_s9  ;;  %24 = sbr.rel (!%p22_p9) target bundleno = 10 (0xa), region = 109 }
0x1779   :  { %2248 = vsyncpa [#allocation7], 1 }
0x177a   :  { %2250 = vsyncpa [#allocation7 + $0x1], 1 }
0x177b   :  { %2251 = vsyncpa [#allocation10], 1 }
0x177c   :  { %2252 = vsyncpa [#allocation13], 1 }
0x177d   :  { %2253 = vsyncpa [#allocation8], 1 }
0x177e   :  { %2255 = vsyncpa [#allocation8 + $0x1], 1 }

</bundles_post_ra>
